<compile_context>
chip_gen: v5e
topology: v5e:2x2
jax: 0.10.0
libtpu: 0.0.40
codegen_flags: <defaults>
</compile_context>

<pallas_src>
import functools

import jax
import jax.numpy as jnp
from jax.experimental import pallas as pl
from jax.experimental.pallas import tpu as pltpu


def _round_up(n, m):
    return ((n + m - 1) // m) * m


def basemodel_kernel(x_ref, w0_ref, b0_ref,
                     wih_ref, bsum_ref, whh_ref,
                     wout_ref, bout_ref,
                     out_ref,
                     seq_scratch, pre_scratch,
                     *, T, B_pad):
    """Whole forward pass in one kernel (lane-dense, padded layout).

    x_ref:     (T*B_pad, Dp)   bf16  (row-major: time outer, padded batch inner)
    w0_ref:    (Dp, Hp)        bf16  fused  W_in^T @ W_ih[0]^T
    b0_ref:    (1, Hp)         f32   fused  b_in @ W_ih[0]^T + b_ih[0] + b_hh[0]
    wih_ref:   (L, Hp, Hp)     bf16  (index 0 unused — fused into w0)
    bsum_ref:  (L, 1, Hp)      f32   pre-summed b_ih + b_hh (index 0 unused)
    whh_ref:   (L, Hp, Hp)     bf16
    wout_ref:  (Hp, Dp)        bf16  bout_ref: (1, Dp) f32
    out_ref:   (T*B_pad, Dp)   f32
    seq_scratch: (T*B_pad, Hp) bf16 VMEM — current layer's outputs over time.
    pre_scratch: (T*B_pad, Hp) f32  VMEM — hoisted input projection of the layer.

    Padded batch rows receive the broadcast biases and evolve non-zero garbage
    through the recurrence; they are independent of real rows and sliced off by
    the wrapper.  Padded hidden/feature columns stay exactly zero.
    """
    L = whh_ref.shape[0]
    Hp = whh_ref.shape[2]
    bf16 = jnp.bfloat16

    for l in range(L):
        # ---- hoisted per-layer input projection: ONE big MXU matmul ----
        if l == 0:
            # in_proj fused with layer-0 W_ih (exact).
            pre_scratch[...] = (
                jnp.dot(x_ref[...], w0_ref[...],
                        preferred_element_type=jnp.float32)
                + b0_ref[...])
        else:
            pre_scratch[...] = (
                jnp.dot(seq_scratch[...], wih_ref[l],
                        preferred_element_type=jnp.float32)
                + bsum_ref[l])

        w_hh = whh_ref[l]                              # (Hp, Hp) bf16

        # ---- serial recurrence: only h @ W_hh (bf16 MXU) + tanh on the chain ----
        h = jnp.zeros((B_pad, Hp), jnp.float32)
        for t in range(T):                             # static unroll, concrete indices
            r = t * B_pad
            h = jnp.tanh(pre_scratch[pl.ds(r, B_pad), :]
                         + jnp.dot(h.astype(bf16), w_hh,
                                   preferred_element_type=jnp.float32))
            seq_scratch[pl.ds(r, B_pad), :] = h.astype(bf16)   # full (16,128) bf16 tile

    # ---- out_proj: one 2-D matmul, lane-dense full-tile store ----
    out_ref[...] = (
        jnp.dot(seq_scratch[...], wout_ref[...],
                preferred_element_type=jnp.float32)
        + bout_ref[...])


def prepare_params(params):
    """One-time parameter prep (pad / transpose / fuse / cast). Hoist out of the
    per-call path — the kernel is microseconds, this is not."""
    H, D = params['w_in'].shape            # PyTorch layout (out, in)
    L = params['w_ih'].shape[0]
    D_pad = _round_up(D, 128)              # lane multiple
    H_pad = _round_up(H, 128)              # lane multiple
    f32, bf16 = jnp.float32, jnp.bfloat16

    w_in_t = params['w_in'].T                              # (D, H)
    wih_t = jnp.transpose(params['w_ih'], (0, 2, 1))       # (L, H, H)
    whh_t = jnp.transpose(params['w_hh'], (0, 2, 1))       # (L, H, H)

    # Fuse in_proj into layer 0 (no nonlinearity between them -> exact).
    w0 = w_in_t @ wih_t[0]                                                  # (D, H)
    b0 = params['b_in'] @ wih_t[0] + params['b_ih'][0] + params['b_hh'][0]  # (H,)
    b_sum = params['b_ih'] + params['b_hh']                                 # (L, H)

    def pad2(a, r, c):
        return jnp.zeros((r, c), f32).at[:a.shape[0], :a.shape[1]].set(a)

    return {
        'w0':    pad2(w0, D_pad, H_pad).astype(bf16),                       # (Dp, Hp)
        'b0':    jnp.zeros((1, H_pad), f32).at[0, :H].set(b0),              # (1, Hp)
        'w_ih':  jnp.zeros((L, H_pad, H_pad), f32)
                    .at[:, :H, :H].set(wih_t).astype(bf16),                 # (L, Hp, Hp)
        'b_sum': jnp.zeros((L, 1, H_pad), f32).at[:, 0, :H].set(b_sum),     # (L, 1, Hp)
        'w_hh':  jnp.zeros((L, H_pad, H_pad), f32)
                    .at[:, :H, :H].set(whh_t).astype(bf16),                 # (L, Hp, Hp)
        'w_out': pad2(params['w_out'].T, H_pad, D_pad).astype(bf16),        # (Hp, Dp)
        'b_out': jnp.zeros((1, D_pad), f32).at[0, :D].set(params['b_out']), # (1, Dp)
    }


@jax.jit
def basemodel_forward(x, prep):
    """Per-call path: pad x (directly in bf16), one gridless pallas_call, slice."""
    T, B, D = x.shape
    D_pad, H_pad = prep['w0'].shape
    bf16 = jnp.bfloat16

    # Pad batch to 16 so bf16 activation tiles/stores are full packed (16,128)
    # tiles (also a multiple of the f32 sublane tile of 8).
    B_pad = _round_up(B, 16)
    TB = T * B_pad

    x_p = (jnp.zeros((T, B_pad, D_pad), bf16)
           .at[:, :B, :D].set(x.astype(bf16))
           .reshape(TB, D_pad))

    vmem = pl.BlockSpec(memory_space=pltpu.MemorySpace.VMEM)

    out = pl.pallas_call(
        functools.partial(basemodel_kernel, T=T, B_pad=B_pad),
        out_shape=jax.ShapeDtypeStruct((TB, D_pad), jnp.float32),
        in_specs=[vmem] * 8,
        out_specs=vmem,
        scratch_shapes=[pltpu.VMEM((TB, H_pad), jnp.bfloat16),   # seq_scratch
                        pltpu.VMEM((TB, H_pad), jnp.float32)],   # pre_scratch
    )(x_p, prep['w0'], prep['b0'], prep['w_ih'], prep['b_sum'],
      prep['w_hh'], prep['w_out'], prep['b_out'])

    # Strip padding back to the logical (T, B, D) output.
    return out.reshape(T, B_pad, D_pad)[:, :B, :D]


def basemodel_reference(x, params):
    """Pure-JAX reference (mirrors PyTorch BaseModel with rnn='rnn', tanh)."""
    w_in, b_in = params['w_in'], params['b_in']
    w_out, b_out = params['w_out'], params['b_out']
    T, B, _ = x.shape
    H = w_in.shape[0]
    L = params['w_ih'].shape[0]

    h_seq = x @ w_in.T + b_in                       # (T, B, H)
    for l in range(L):
        w_ih, w_hh = params['w_ih'][l], params['w_hh'][l]
        b_ih, b_hh = params['b_ih'][l], params['b_hh'][l]
        h = jnp.zeros((B, H), jnp.float32)
        outs = []
        for t in range(T):
            h = jnp.tanh(h_seq[t] @ w_ih.T + b_ih + h @ w_hh.T + b_hh)
            outs.append(h)
        h_seq = jnp.stack(outs, axis=0)
    return h_seq @ w_out.T + b_out                  # (T, B, D)


def make_params(key, input_dim, hidden_dim, num_layers):
    """Deterministic synthetic parameters, PyTorch (out,in) layout."""
    ks = jax.random.split(key, 8)
    s = 0.1
    return {
        'w_in':  s * jax.random.normal(ks[0], (hidden_dim, input_dim), jnp.float32),
        'b_in':  s * jax.random.normal(ks[1], (hidden_dim,), jnp.float32),
        'w_ih':  s * jax.random.normal(ks[2], (num_layers, hidden_dim, hidden_dim), jnp.float32),
        'w_hh':  s * jax.random.normal(ks[3], (num_layers, hidden_dim, hidden_dim), jnp.float32),
        'b_ih':  s * jax.random.normal(ks[4], (num_layers, hidden_dim), jnp.float32),
        'b_hh':  s * jax.random.normal(ks[5], (num_layers, hidden_dim), jnp.float32),
        'w_out': s * jax.random.normal(ks[6], (input_dim, hidden_dim), jnp.float32),
        'b_out': s * jax.random.normal(ks[7], (input_dim,), jnp.float32),
    }


if __name__ == "__main__":
    T, B, D, H, L = 8, 2, 16, 32, 3          # seq, batch, input_dim, hidden_dim, num_layers

    key = jax.random.PRNGKey(0)
    kx, kp = jax.random.split(key)
    x = jax.random.normal(kx, (T, B, D), jnp.float32)
    params = make_params(kp, D, H, L)

    prep = prepare_params(params)            # one-time prep, hoisted off the call path
    out = basemodel_forward(x, prep)
    out = jax.block_until_ready(out)

    ref = basemodel_reference(x, params)
    assert out.shape == (T, B, D)
    assert jnp.allclose(out, ref, rtol=2e-2, atol=2e-2), "kernel mismatch vs reference"

    # TODO(synk): only the rnn='rnn' (tanh RNN) path of BaseModel is implemented;
    # the 'lstm'/'mlp' constructor variants are not exercised by the default config.

    print("KERNEL_OK")
</pallas_src>

<mosaic_0001>
module attributes {stable_mosaic.version = 11 : i64} {
  func.func @basemodel_kernel(%arg0: memref<128x128xbf16, #tpu.memory_space<vmem>>, %arg1: memref<128x128xbf16, #tpu.memory_space<vmem>>, %arg2: memref<1x128xf32, #tpu.memory_space<vmem>>, %arg3: memref<3x128x128xbf16, #tpu.memory_space<vmem>>, %arg4: memref<3x1x128xf32, #tpu.memory_space<vmem>>, %arg5: memref<3x128x128xbf16, #tpu.memory_space<vmem>>, %arg6: memref<128x128xbf16, #tpu.memory_space<vmem>>, %arg7: memref<1x128xf32, #tpu.memory_space<vmem>>, %arg8: memref<128x128xf32, #tpu.memory_space<vmem>>, %arg9: memref<128x128xbf16, #tpu.memory_space<vmem>>, %arg10: memref<128x128xf32, #tpu.memory_space<vmem>>) attributes {dimension_semantics = [], scalar_prefetch = 0 : i64, scratch_operands = 2 : i64, tpu.core_type = #tpu.core_type<tc>} {
    %c0 = arith.constant 0 : index
    %c0_0 = arith.constant 0 : index
    %0 = vector.load %arg0[%c0, %c0_0] : memref<128x128xbf16, #tpu.memory_space<vmem>>, vector<128x128xbf16>
    %c0_1 = arith.constant 0 : index
    %c0_2 = arith.constant 0 : index
    %1 = vector.load %arg1[%c0_1, %c0_2] : memref<128x128xbf16, #tpu.memory_space<vmem>>, vector<128x128xbf16>
    %cst = arith.constant dense<0.000000e+00> : vector<128x128xf32>
    %2 = tpu.matmul %0, %1, %cst {dimension_numbers = #tpu.dot_dimension_numbers<[1], [0], [0], [1], [0, 0, 1, 1], [], []>} : vector<128x128xbf16>, vector<128x128xbf16>, vector<128x128xf32> -> vector<128x128xf32>
    %c0_3 = arith.constant 0 : index
    %c0_4 = arith.constant 0 : index
    %3 = vector.load %arg2[%c0_3, %c0_4] : memref<1x128xf32, #tpu.memory_space<vmem>>, vector<1x128xf32>
    %4 = vector.broadcast %3 : vector<1x128xf32> to vector<128x128xf32>
    %5 = arith.addf %2, %4 : vector<128x128xf32>
    %c0_5 = arith.constant 0 : index
    %c0_6 = arith.constant 0 : index
    %6 = vector.load %arg10[%c0_5, %c0_6] : memref<128x128xf32, #tpu.memory_space<vmem>>, vector<128x128xf32>
    tpu.vector_store %arg10[%c0_5, %c0_6], %5 {strides = array<i32>} : memref<128x128xf32, #tpu.memory_space<vmem>>, vector<128x128xf32>,
    %c0_7 = arith.constant 0 : index
    %c0_8 = arith.constant 0 : index
    %c0_9 = arith.constant 0 : index
    %7 = vector.load %arg5[%c0_7, %c0_8, %c0_9] : memref<3x128x128xbf16, #tpu.memory_space<vmem>>, vector<1x128x128xbf16>
    %8 = vector.shape_cast %7 : vector<1x128x128xbf16> to vector<128x128xbf16>
    %cst_10 = arith.constant 0.000000e+00 : f32
    %9 = vector.broadcast %cst_10 : f32 to vector<16x128xf32>
    %c0_11 = arith.constant 0 : index
    %c0_12 = arith.constant 0 : index
    %10 = vector.load %arg10[%c0_11, %c0_12] : memref<128x128xf32, #tpu.memory_space<vmem>>, vector<16x128xf32>
    %11 = arith.truncf %9 : vector<16x128xf32> to vector<16x128xbf16>
    %cst_13 = arith.constant dense<0.000000e+00> : vector<16x128xf32>
    %12 = tpu.matmul %11, %8, %cst_13 {dimension_numbers = #tpu.dot_dimension_numbers<[1], [0], [0], [1], [0, 0, 1, 1], [], []>} : vector<16x128xbf16>, vector<128x128xbf16>, vector<16x128xf32> -> vector<16x128xf32>
    %13 = arith.addf %10, %12 : vector<16x128xf32>
    %14 = math.tanh %13 : vector<16x128xf32>
    %15 = arith.truncf %14 : vector<16x128xf32> to vector<16x128xbf16>
    %c0_14 = arith.constant 0 : index
    %c0_15 = arith.constant 0 : index
    %16 = vector.load %arg9[%c0_14, %c0_15] : memref<128x128xbf16, #tpu.memory_space<vmem>>, vector<16x128xbf16>
    tpu.vector_store %arg9[%c0_14, %c0_15], %15 {strides = array<i32>} : memref<128x128xbf16, #tpu.memory_space<vmem>>, vector<16x128xbf16>,
    %c16 = arith.constant 16 : index
    %c0_16 = arith.constant 0 : index
    %17 = vector.load %arg10[%c16, %c0_16] : memref<128x128xf32, #tpu.memory_space<vmem>>, vector<16x128xf32>
    %18 = arith.truncf %14 : vector<16x128xf32> to vector<16x128xbf16>
    %cst_17 = arith.constant dense<0.000000e+00> : vector<16x128xf32>
    %19 = tpu.matmul %18, %8, %cst_17 {dimension_numbers = #tpu.dot_dimension_numbers<[1], [0], [0], [1], [0, 0, 1, 1], [], []>} : vector<16x128xbf16>, vector<128x128xbf16>, vector<16x128xf32> -> vector<16x128xf32>
    %20 = arith.addf %17, %19 : vector<16x128xf32>
    %21 = math.tanh %20 : vector<16x128xf32>
    %22 = arith.truncf %21 : vector<16x128xf32> to vector<16x128xbf16>
    %c16_18 = arith.constant 16 : index
    %c0_19 = arith.constant 0 : index
    %23 = vector.load %arg9[%c16_18, %c0_19] : memref<128x128xbf16, #tpu.memory_space<vmem>>, vector<16x128xbf16>
    tpu.vector_store %arg9[%c16_18, %c0_19], %22 {strides = array<i32>} : memref<128x128xbf16, #tpu.memory_space<vmem>>, vector<16x128xbf16>,
    %c32 = arith.constant 32 : index
    %c0_20 = arith.constant 0 : index
    %24 = vector.load %arg10[%c32, %c0_20] : memref<128x128xf32, #tpu.memory_space<vmem>>, vector<16x128xf32>
    %25 = arith.truncf %21 : vector<16x128xf32> to vector<16x128xbf16>
    %cst_21 = arith.constant dense<0.000000e+00> : vector<16x128xf32>
    %26 = tpu.matmul %25, %8, %cst_21 {dimension_numbers = #tpu.dot_dimension_numbers<[1], [0], [0], [1], [0, 0, 1, 1], [], []>} : vector<16x128xbf16>, vector<128x128xbf16>, vector<16x128xf32> -> vector<16x128xf32>
    %27 = arith.addf %24, %26 : vector<16x128xf32>
    %28 = math.tanh %27 : vector<16x128xf32>
    %29 = arith.truncf %28 : vector<16x128xf32> to vector<16x128xbf16>
    %c32_22 = arith.constant 32 : index
    %c0_23 = arith.constant 0 : index
    %30 = vector.load %arg9[%c32_22, %c0_23] : memref<128x128xbf16, #tpu.memory_space<vmem>>, vector<16x128xbf16>
    tpu.vector_store %arg9[%c32_22, %c0_23], %29 {strides = array<i32>} : memref<128x128xbf16, #tpu.memory_space<vmem>>, vector<16x128xbf16>,
    %c48 = arith.constant 48 : index
    %c0_24 = arith.constant 0 : index
    %31 = vector.load %arg10[%c48, %c0_24] : memref<128x128xf32, #tpu.memory_space<vmem>>, vector<16x128xf32>
    %32 = arith.truncf %28 : vector<16x128xf32> to vector<16x128xbf16>
    %cst_25 = arith.constant dense<0.000000e+00> : vector<16x128xf32>
    %33 = tpu.matmul %32, %8, %cst_25 {dimension_numbers = #tpu.dot_dimension_numbers<[1], [0], [0], [1], [0, 0, 1, 1], [], []>} : vector<16x128xbf16>, vector<128x128xbf16>, vector<16x128xf32> -> vector<16x128xf32>
    %34 = arith.addf %31, %33 : vector<16x128xf32>
    %35 = math.tanh %34 : vector<16x128xf32>
    %36 = arith.truncf %35 : vector<16x128xf32> to vector<16x128xbf16>
    %c48_26 = arith.constant 48 : index
    %c0_27 = arith.constant 0 : index
    %37 = vector.load %arg9[%c48_26, %c0_27] : memref<128x128xbf16, #tpu.memory_space<vmem>>, vector<16x128xbf16>
    tpu.vector_store %arg9[%c48_26, %c0_27], %36 {strides = array<i32>} : memref<128x128xbf16, #tpu.memory_space<vmem>>, vector<16x128xbf16>,
    %c64 = arith.constant 64 : index
    %c0_28 = arith.constant 0 : index
    %38 = vector.load %arg10[%c64, %c0_28] : memref<128x128xf32, #tpu.memory_space<vmem>>, vector<16x128xf32>
    %39 = arith.truncf %35 : vector<16x128xf32> to vector<16x128xbf16>
    %cst_29 = arith.constant dense<0.000000e+00> : vector<16x128xf32>
    %40 = tpu.matmul %39, %8, %cst_29 {dimension_numbers = #tpu.dot_dimension_numbers<[1], [0], [0], [1], [0, 0, 1, 1], [], []>} : vector<16x128xbf16>, vector<128x128xbf16>, vector<16x128xf32> -> vector<16x128xf32>
    %41 = arith.addf %38, %40 : vector<16x128xf32>
    %42 = math.tanh %41 : vector<16x128xf32>
    %43 = arith.truncf %42 : vector<16x128xf32> to vector<16x128xbf16>
    %c64_30 = arith.constant 64 : index
    %c0_31 = arith.constant 0 : index
    %44 = vector.load %arg9[%c64_30, %c0_31] : memref<128x128xbf16, #tpu.memory_space<vmem>>, vector<16x128xbf16>
    tpu.vector_store %arg9[%c64_30, %c0_31], %43 {strides = array<i32>} : memref<128x128xbf16, #tpu.memory_space<vmem>>, vector<16x128xbf16>,
    %c80 = arith.constant 80 : index
    %c0_32 = arith.constant 0 : index
    %45 = vector.load %arg10[%c80, %c0_32] : memref<128x128xf32, #tpu.memory_space<vmem>>, vector<16x128xf32>
    %46 = arith.truncf %42 : vector<16x128xf32> to vector<16x128xbf16>
    %cst_33 = arith.constant dense<0.000000e+00> : vector<16x128xf32>
    %47 = tpu.matmul %46, %8, %cst_33 {dimension_numbers = #tpu.dot_dimension_numbers<[1], [0], [0], [1], [0, 0, 1, 1], [], []>} : vector<16x128xbf16>, vector<128x128xbf16>, vector<16x128xf32> -> vector<16x128xf32>
    %48 = arith.addf %45, %47 : vector<16x128xf32>
    %49 = math.tanh %48 : vector<16x128xf32>
    %50 = arith.truncf %49 : vector<16x128xf32> to vector<16x128xbf16>
    %c80_34 = arith.constant 80 : index
    %c0_35 = arith.constant 0 : index
    %51 = vector.load %arg9[%c80_34, %c0_35] : memref<128x128xbf16, #tpu.memory_space<vmem>>, vector<16x128xbf16>
    tpu.vector_store %arg9[%c80_34, %c0_35], %50 {strides = array<i32>} : memref<128x128xbf16, #tpu.memory_space<vmem>>, vector<16x128xbf16>,
    %c96 = arith.constant 96 : index
    %c0_36 = arith.constant 0 : index
    %52 = vector.load %arg10[%c96, %c0_36] : memref<128x128xf32, #tpu.memory_space<vmem>>, vector<16x128xf32>
    %53 = arith.truncf %49 : vector<16x128xf32> to vector<16x128xbf16>
    %cst_37 = arith.constant dense<0.000000e+00> : vector<16x128xf32>
    %54 = tpu.matmul %53, %8, %cst_37 {dimension_numbers = #tpu.dot_dimension_numbers<[1], [0], [0], [1], [0, 0, 1, 1], [], []>} : vector<16x128xbf16>, vector<128x128xbf16>, vector<16x128xf32> -> vector<16x128xf32>
    %55 = arith.addf %52, %54 : vector<16x128xf32>
    %56 = math.tanh %55 : vector<16x128xf32>
    %57 = arith.truncf %56 : vector<16x128xf32> to vector<16x128xbf16>
    %c96_38 = arith.constant 96 : index
    %c0_39 = arith.constant 0 : index
    %58 = vector.load %arg9[%c96_38, %c0_39] : memref<128x128xbf16, #tpu.memory_space<vmem>>, vector<16x128xbf16>
    tpu.vector_store %arg9[%c96_38, %c0_39], %57 {strides = array<i32>} : memref<128x128xbf16, #tpu.memory_space<vmem>>, vector<16x128xbf16>,
    %c112 = arith.constant 112 : index
    %c0_40 = arith.constant 0 : index
    %59 = vector.load %arg10[%c112, %c0_40] : memref<128x128xf32, #tpu.memory_space<vmem>>, vector<16x128xf32>
    %60 = arith.truncf %56 : vector<16x128xf32> to vector<16x128xbf16>
    %cst_41 = arith.constant dense<0.000000e+00> : vector<16x128xf32>
    %61 = tpu.matmul %60, %8, %cst_41 {dimension_numbers = #tpu.dot_dimension_numbers<[1], [0], [0], [1], [0, 0, 1, 1], [], []>} : vector<16x128xbf16>, vector<128x128xbf16>, vector<16x128xf32> -> vector<16x128xf32>
    %62 = arith.addf %59, %61 : vector<16x128xf32>
    %63 = math.tanh %62 : vector<16x128xf32>
    %64 = arith.truncf %63 : vector<16x128xf32> to vector<16x128xbf16>
    %c112_42 = arith.constant 112 : index
    %c0_43 = arith.constant 0 : index
    %65 = vector.load %arg9[%c112_42, %c0_43] : memref<128x128xbf16, #tpu.memory_space<vmem>>, vector<16x128xbf16>
    tpu.vector_store %arg9[%c112_42, %c0_43], %64 {strides = array<i32>} : memref<128x128xbf16, #tpu.memory_space<vmem>>, vector<16x128xbf16>,
    %c0_44 = arith.constant 0 : index
    %c0_45 = arith.constant 0 : index
    %66 = vector.load %arg9[%c0_44, %c0_45] : memref<128x128xbf16, #tpu.memory_space<vmem>>, vector<128x128xbf16>
    %c1 = arith.constant 1 : index
    %c0_46 = arith.constant 0 : index
    %c0_47 = arith.constant 0 : index
    %67 = vector.load %arg3[%c1, %c0_46, %c0_47] : memref<3x128x128xbf16, #tpu.memory_space<vmem>>, vector<1x128x128xbf16>
    %68 = vector.shape_cast %67 : vector<1x128x128xbf16> to vector<128x128xbf16>
    %cst_48 = arith.constant dense<0.000000e+00> : vector<128x128xf32>
    %69 = tpu.matmul %66, %68, %cst_48 {dimension_numbers = #tpu.dot_dimension_numbers<[1], [0], [0], [1], [0, 0, 1, 1], [], []>} : vector<128x128xbf16>, vector<128x128xbf16>, vector<128x128xf32> -> vector<128x128xf32>
    %c1_49 = arith.constant 1 : index
    %c0_50 = arith.constant 0 : index
    %c0_51 = arith.constant 0 : index
    %70 = vector.load %arg4[%c1_49, %c0_50, %c0_51] : memref<3x1x128xf32, #tpu.memory_space<vmem>>, vector<1x1x128xf32>
    %71 = vector.shape_cast %70 : vector<1x1x128xf32> to vector<1x128xf32>
    %72 = vector.broadcast %71 : vector<1x128xf32> to vector<128x128xf32>
    %73 = arith.addf %69, %72 : vector<128x128xf32>
    %c0_52 = arith.constant 0 : index
    %c0_53 = arith.constant 0 : index
    %74 = vector.load %arg10[%c0_52, %c0_53] : memref<128x128xf32, #tpu.memory_space<vmem>>, vector<128x128xf32>
    tpu.vector_store %arg10[%c0_52, %c0_53], %73 {strides = array<i32>} : memref<128x128xf32, #tpu.memory_space<vmem>>, vector<128x128xf32>,
    %c1_54 = arith.constant 1 : index
    %c0_55 = arith.constant 0 : index
    %c0_56 = arith.constant 0 : index
    %75 = vector.load %arg5[%c1_54, %c0_55, %c0_56] : memref<3x128x128xbf16, #tpu.memory_space<vmem>>, vector<1x128x128xbf16>
    %76 = vector.shape_cast %75 : vector<1x128x128xbf16> to vector<128x128xbf16>
    %cst_57 = arith.constant 0.000000e+00 : f32
    %77 = vector.broadcast %cst_57 : f32 to vector<16x128xf32>
    %c0_58 = arith.constant 0 : index
    %c0_59 = arith.constant 0 : index
    %78 = vector.load %arg10[%c0_58, %c0_59] : memref<128x128xf32, #tpu.memory_space<vmem>>, vector<16x128xf32>
    %79 = arith.truncf %77 : vector<16x128xf32> to vector<16x128xbf16>
    %cst_60 = arith.constant dense<0.000000e+00> : vector<16x128xf32>
    %80 = tpu.matmul %79, %76, %cst_60 {dimension_numbers = #tpu.dot_dimension_numbers<[1], [0], [0], [1], [0, 0, 1, 1], [], []>} : vector<16x128xbf16>, vector<128x128xbf16>, vector<16x128xf32> -> vector<16x128xf32>
    %81 = arith.addf %78, %80 : vector<16x128xf32>
    %82 = math.tanh %81 : vector<16x128xf32>
    %83 = arith.truncf %82 : vector<16x128xf32> to vector<16x128xbf16>
    %c0_61 = arith.constant 0 : index
    %c0_62 = arith.constant 0 : index
    %84 = vector.load %arg9[%c0_61, %c0_62] : memref<128x128xbf16, #tpu.memory_space<vmem>>, vector<16x128xbf16>
    tpu.vector_store %arg9[%c0_61, %c0_62], %83 {strides = array<i32>} : memref<128x128xbf16, #tpu.memory_space<vmem>>, vector<16x128xbf16>,
    %c16_63 = arith.constant 16 : index
    %c0_64 = arith.constant 0 : index
    %85 = vector.load %arg10[%c16_63, %c0_64] : memref<128x128xf32, #tpu.memory_space<vmem>>, vector<16x128xf32>
    %86 = arith.truncf %82 : vector<16x128xf32> to vector<16x128xbf16>
    %cst_65 = arith.constant dense<0.000000e+00> : vector<16x128xf32>
    %87 = tpu.matmul %86, %76, %cst_65 {dimension_numbers = #tpu.dot_dimension_numbers<[1], [0], [0], [1], [0, 0, 1, 1], [], []>} : vector<16x128xbf16>, vector<128x128xbf16>, vector<16x128xf32> -> vector<16x128xf32>
    %88 = arith.addf %85, %87 : vector<16x128xf32>
    %89 = math.tanh %88 : vector<16x128xf32>
    %90 = arith.truncf %89 : vector<16x128xf32> to vector<16x128xbf16>
    %c16_66 = arith.constant 16 : index
    %c0_67 = arith.constant 0 : index
    %91 = vector.load %arg9[%c16_66, %c0_67] : memref<128x128xbf16, #tpu.memory_space<vmem>>, vector<16x128xbf16>
    tpu.vector_store %arg9[%c16_66, %c0_67], %90 {strides = array<i32>} : memref<128x128xbf16, #tpu.memory_space<vmem>>, vector<16x128xbf16>,
    %c32_68 = arith.constant 32 : index
    %c0_69 = arith.constant 0 : index
    %92 = vector.load %arg10[%c32_68, %c0_69] : memref<128x128xf32, #tpu.memory_space<vmem>>, vector<16x128xf32>
    %93 = arith.truncf %89 : vector<16x128xf32> to vector<16x128xbf16>
    %cst_70 = arith.constant dense<0.000000e+00> : vector<16x128xf32>
    %94 = tpu.matmul %93, %76, %cst_70 {dimension_numbers = #tpu.dot_dimension_numbers<[1], [0], [0], [1], [0, 0, 1, 1], [], []>} : vector<16x128xbf16>, vector<128x128xbf16>, vector<16x128xf32> -> vector<16x128xf32>
    %95 = arith.addf %92, %94 : vector<16x128xf32>
    %96 = math.tanh %95 : vector<16x128xf32>
    %97 = arith.truncf %96 : vector<16x128xf32> to vector<16x128xbf16>
    %c32_71 = arith.constant 32 : index
    %c0_72 = arith.constant 0 : index
    %98 = vector.load %arg9[%c32_71, %c0_72] : memref<128x128xbf16, #tpu.memory_space<vmem>>, vector<16x128xbf16>
    tpu.vector_store %arg9[%c32_71, %c0_72], %97 {strides = array<i32>} : memref<128x128xbf16, #tpu.memory_space<vmem>>, vector<16x128xbf16>,
    %c48_73 = arith.constant 48 : index
    %c0_74 = arith.constant 0 : index
    %99 = vector.load %arg10[%c48_73, %c0_74] : memref<128x128xf32, #tpu.memory_space<vmem>>, vector<16x128xf32>
    %100 = arith.truncf %96 : vector<16x128xf32> to vector<16x128xbf16>
    %cst_75 = arith.constant dense<0.000000e+00> : vector<16x128xf32>
    %101 = tpu.matmul %100, %76, %cst_75 {dimension_numbers = #tpu.dot_dimension_numbers<[1], [0], [0], [1], [0, 0, 1, 1], [], []>} : vector<16x128xbf16>, vector<128x128xbf16>, vector<16x128xf32> -> vector<16x128xf32>
    %102 = arith.addf %99, %101 : vector<16x128xf32>
    %103 = math.tanh %102 : vector<16x128xf32>
    %104 = arith.truncf %103 : vector<16x128xf32> to vector<16x128xbf16>
    %c48_76 = arith.constant 48 : index
    %c0_77 = arith.constant 0 : index
    %105 = vector.load %arg9[%c48_76, %c0_77] : memref<128x128xbf16, #tpu.memory_space<vmem>>, vector<16x128xbf16>
    tpu.vector_store %arg9[%c48_76, %c0_77], %104 {strides = array<i32>} : memref<128x128xbf16, #tpu.memory_space<vmem>>, vector<16x128xbf16>,
    %c64_78 = arith.constant 64 : index
    %c0_79 = arith.constant 0 : index
    %106 = vector.load %arg10[%c64_78, %c0_79] : memref<128x128xf32, #tpu.memory_space<vmem>>, vector<16x128xf32>
    %107 = arith.truncf %103 : vector<16x128xf32> to vector<16x128xbf16>
    %cst_80 = arith.constant dense<0.000000e+00> : vector<16x128xf32>
    %108 = tpu.matmul %107, %76, %cst_80 {dimension_numbers = #tpu.dot_dimension_numbers<[1], [0], [0], [1], [0, 0, 1, 1], [], []>} : vector<16x128xbf16>, vector<128x128xbf16>, vector<16x128xf32> -> vector<16x128xf32>
    %109 = arith.addf %106, %108 : vector<16x128xf32>
    %110 = math.tanh %109 : vector<16x128xf32>
    %111 = arith.truncf %110 : vector<16x128xf32> to vector<16x128xbf16>
    %c64_81 = arith.constant 64 : index
    %c0_82 = arith.constant 0 : index
    %112 = vector.load %arg9[%c64_81, %c0_82] : memref<128x128xbf16, #tpu.memory_space<vmem>>, vector<16x128xbf16>
    tpu.vector_store %arg9[%c64_81, %c0_82], %111 {strides = array<i32>} : memref<128x128xbf16, #tpu.memory_space<vmem>>, vector<16x128xbf16>,
    %c80_83 = arith.constant 80 : index
    %c0_84 = arith.constant 0 : index
    %113 = vector.load %arg10[%c80_83, %c0_84] : memref<128x128xf32, #tpu.memory_space<vmem>>, vector<16x128xf32>
    %114 = arith.truncf %110 : vector<16x128xf32> to vector<16x128xbf16>
    %cst_85 = arith.constant dense<0.000000e+00> : vector<16x128xf32>
    %115 = tpu.matmul %114, %76, %cst_85 {dimension_numbers = #tpu.dot_dimension_numbers<[1], [0], [0], [1], [0, 0, 1, 1], [], []>} : vector<16x128xbf16>, vector<128x128xbf16>, vector<16x128xf32> -> vector<16x128xf32>
    %116 = arith.addf %113, %115 : vector<16x128xf32>
    %117 = math.tanh %116 : vector<16x128xf32>
    %118 = arith.truncf %117 : vector<16x128xf32> to vector<16x128xbf16>
    %c80_86 = arith.constant 80 : index
    %c0_87 = arith.constant 0 : index
    %119 = vector.load %arg9[%c80_86, %c0_87] : memref<128x128xbf16, #tpu.memory_space<vmem>>, vector<16x128xbf16>
    tpu.vector_store %arg9[%c80_86, %c0_87], %118 {strides = array<i32>} : memref<128x128xbf16, #tpu.memory_space<vmem>>, vector<16x128xbf16>,
    %c96_88 = arith.constant 96 : index
    %c0_89 = arith.constant 0 : index
    %120 = vector.load %arg10[%c96_88, %c0_89] : memref<128x128xf32, #tpu.memory_space<vmem>>, vector<16x128xf32>
    %121 = arith.truncf %117 : vector<16x128xf32> to vector<16x128xbf16>
    %cst_90 = arith.constant dense<0.000000e+00> : vector<16x128xf32>
    %122 = tpu.matmul %121, %76, %cst_90 {dimension_numbers = #tpu.dot_dimension_numbers<[1], [0], [0], [1], [0, 0, 1, 1], [], []>} : vector<16x128xbf16>, vector<128x128xbf16>, vector<16x128xf32> -> vector<16x128xf32>
    %123 = arith.addf %120, %122 : vector<16x128xf32>
    %124 = math.tanh %123 : vector<16x128xf32>
    %125 = arith.truncf %124 : vector<16x128xf32> to vector<16x128xbf16>
    %c96_91 = arith.constant 96 : index
    %c0_92 = arith.constant 0 : index
    %126 = vector.load %arg9[%c96_91, %c0_92] : memref<128x128xbf16, #tpu.memory_space<vmem>>, vector<16x128xbf16>
    tpu.vector_store %arg9[%c96_91, %c0_92], %125 {strides = array<i32>} : memref<128x128xbf16, #tpu.memory_space<vmem>>, vector<16x128xbf16>,
    %c112_93 = arith.constant 112 : index
    %c0_94 = arith.constant 0 : index
    %127 = vector.load %arg10[%c112_93, %c0_94] : memref<128x128xf32, #tpu.memory_space<vmem>>, vector<16x128xf32>
    %128 = arith.truncf %124 : vector<16x128xf32> to vector<16x128xbf16>
    %cst_95 = arith.constant dense<0.000000e+00> : vector<16x128xf32>
    %129 = tpu.matmul %128, %76, %cst_95 {dimension_numbers = #tpu.dot_dimension_numbers<[1], [0], [0], [1], [0, 0, 1, 1], [], []>} : vector<16x128xbf16>, vector<128x128xbf16>, vector<16x128xf32> -> vector<16x128xf32>
    %130 = arith.addf %127, %129 : vector<16x128xf32>
    %131 = math.tanh %130 : vector<16x128xf32>
    %132 = arith.truncf %131 : vector<16x128xf32> to vector<16x128xbf16>
    %c112_96 = arith.constant 112 : index
    %c0_97 = arith.constant 0 : index
    %133 = vector.load %arg9[%c112_96, %c0_97] : memref<128x128xbf16, #tpu.memory_space<vmem>>, vector<16x128xbf16>
    tpu.vector_store %arg9[%c112_96, %c0_97], %132 {strides = array<i32>} : memref<128x128xbf16, #tpu.memory_space<vmem>>, vector<16x128xbf16>,
    %c0_98 = arith.constant 0 : index
    %c0_99 = arith.constant 0 : index
    %134 = vector.load %arg9[%c0_98, %c0_99] : memref<128x128xbf16, #tpu.memory_space<vmem>>, vector<128x128xbf16>
    %c2 = arith.constant 2 : index
    %c0_100 = arith.constant 0 : index
    %c0_101 = arith.constant 0 : index
    %135 = vector.load %arg3[%c2, %c0_100, %c0_101] : memref<3x128x128xbf16, #tpu.memory_space<vmem>>, vector<1x128x128xbf16>
    %136 = vector.shape_cast %135 : vector<1x128x128xbf16> to vector<128x128xbf16>
    %cst_102 = arith.constant dense<0.000000e+00> : vector<128x128xf32>
    %137 = tpu.matmul %134, %136, %cst_102 {dimension_numbers = #tpu.dot_dimension_numbers<[1], [0], [0], [1], [0, 0, 1, 1], [], []>} : vector<128x128xbf16>, vector<128x128xbf16>, vector<128x128xf32> -> vector<128x128xf32>
    %c2_103 = arith.constant 2 : index
    %c0_104 = arith.constant 0 : index
    %c0_105 = arith.constant 0 : index
    %138 = vector.load %arg4[%c2_103, %c0_104, %c0_105] : memref<3x1x128xf32, #tpu.memory_space<vmem>>, vector<1x1x128xf32>
    %139 = vector.shape_cast %138 : vector<1x1x128xf32> to vector<1x128xf32>
    %140 = vector.broadcast %139 : vector<1x128xf32> to vector<128x128xf32>
    %141 = arith.addf %137, %140 : vector<128x128xf32>
    %c0_106 = arith.constant 0 : index
    %c0_107 = arith.constant 0 : index
    %142 = vector.load %arg10[%c0_106, %c0_107] : memref<128x128xf32, #tpu.memory_space<vmem>>, vector<128x128xf32>
    tpu.vector_store %arg10[%c0_106, %c0_107], %141 {strides = array<i32>} : memref<128x128xf32, #tpu.memory_space<vmem>>, vector<128x128xf32>,
    %c2_108 = arith.constant 2 : index
    %c0_109 = arith.constant 0 : index
    %c0_110 = arith.constant 0 : index
    %143 = vector.load %arg5[%c2_108, %c0_109, %c0_110] : memref<3x128x128xbf16, #tpu.memory_space<vmem>>, vector<1x128x128xbf16>
    %144 = vector.shape_cast %143 : vector<1x128x128xbf16> to vector<128x128xbf16>
    %cst_111 = arith.constant 0.000000e+00 : f32
    %145 = vector.broadcast %cst_111 : f32 to vector<16x128xf32>
    %c0_112 = arith.constant 0 : index
    %c0_113 = arith.constant 0 : index
    %146 = vector.load %arg10[%c0_112, %c0_113] : memref<128x128xf32, #tpu.memory_space<vmem>>, vector<16x128xf32>
    %147 = arith.truncf %145 : vector<16x128xf32> to vector<16x128xbf16>
    %cst_114 = arith.constant dense<0.000000e+00> : vector<16x128xf32>
    %148 = tpu.matmul %147, %144, %cst_114 {dimension_numbers = #tpu.dot_dimension_numbers<[1], [0], [0], [1], [0, 0, 1, 1], [], []>} : vector<16x128xbf16>, vector<128x128xbf16>, vector<16x128xf32> -> vector<16x128xf32>
    %149 = arith.addf %146, %148 : vector<16x128xf32>
    %150 = math.tanh %149 : vector<16x128xf32>
    %151 = arith.truncf %150 : vector<16x128xf32> to vector<16x128xbf16>
    %c0_115 = arith.constant 0 : index
    %c0_116 = arith.constant 0 : index
    %152 = vector.load %arg9[%c0_115, %c0_116] : memref<128x128xbf16, #tpu.memory_space<vmem>>, vector<16x128xbf16>
    tpu.vector_store %arg9[%c0_115, %c0_116], %151 {strides = array<i32>} : memref<128x128xbf16, #tpu.memory_space<vmem>>, vector<16x128xbf16>,
    %c16_117 = arith.constant 16 : index
    %c0_118 = arith.constant 0 : index
    %153 = vector.load %arg10[%c16_117, %c0_118] : memref<128x128xf32, #tpu.memory_space<vmem>>, vector<16x128xf32>
    %154 = arith.truncf %150 : vector<16x128xf32> to vector<16x128xbf16>
    %cst_119 = arith.constant dense<0.000000e+00> : vector<16x128xf32>
    %155 = tpu.matmul %154, %144, %cst_119 {dimension_numbers = #tpu.dot_dimension_numbers<[1], [0], [0], [1], [0, 0, 1, 1], [], []>} : vector<16x128xbf16>, vector<128x128xbf16>, vector<16x128xf32> -> vector<16x128xf32>
    %156 = arith.addf %153, %155 : vector<16x128xf32>
    %157 = math.tanh %156 : vector<16x128xf32>
    %158 = arith.truncf %157 : vector<16x128xf32> to vector<16x128xbf16>
    %c16_120 = arith.constant 16 : index
    %c0_121 = arith.constant 0 : index
    %159 = vector.load %arg9[%c16_120, %c0_121] : memref<128x128xbf16, #tpu.memory_space<vmem>>, vector<16x128xbf16>
    tpu.vector_store %arg9[%c16_120, %c0_121], %158 {strides = array<i32>} : memref<128x128xbf16, #tpu.memory_space<vmem>>, vector<16x128xbf16>,
    %c32_122 = arith.constant 32 : index
    %c0_123 = arith.constant 0 : index
    %160 = vector.load %arg10[%c32_122, %c0_123] : memref<128x128xf32, #tpu.memory_space<vmem>>, vector<16x128xf32>
    %161 = arith.truncf %157 : vector<16x128xf32> to vector<16x128xbf16>
    %cst_124 = arith.constant dense<0.000000e+00> : vector<16x128xf32>
    %162 = tpu.matmul %161, %144, %cst_124 {dimension_numbers = #tpu.dot_dimension_numbers<[1], [0], [0], [1], [0, 0, 1, 1], [], []>} : vector<16x128xbf16>, vector<128x128xbf16>, vector<16x128xf32> -> vector<16x128xf32>
    %163 = arith.addf %160, %162 : vector<16x128xf32>
    %164 = math.tanh %163 : vector<16x128xf32>
    %165 = arith.truncf %164 : vector<16x128xf32> to vector<16x128xbf16>
    %c32_125 = arith.constant 32 : index
    %c0_126 = arith.constant 0 : index
    %166 = vector.load %arg9[%c32_125, %c0_126] : memref<128x128xbf16, #tpu.memory_space<vmem>>, vector<16x128xbf16>
    tpu.vector_store %arg9[%c32_125, %c0_126], %165 {strides = array<i32>} : memref<128x128xbf16, #tpu.memory_space<vmem>>, vector<16x128xbf16>,
    %c48_127 = arith.constant 48 : index
    %c0_128 = arith.constant 0 : index
    %167 = vector.load %arg10[%c48_127, %c0_128] : memref<128x128xf32, #tpu.memory_space<vmem>>, vector<16x128xf32>
    %168 = arith.truncf %164 : vector<16x128xf32> to vector<16x128xbf16>
    %cst_129 = arith.constant dense<0.000000e+00> : vector<16x128xf32>
    %169 = tpu.matmul %168, %144, %cst_129 {dimension_numbers = #tpu.dot_dimension_numbers<[1], [0], [0], [1], [0, 0, 1, 1], [], []>} : vector<16x128xbf16>, vector<128x128xbf16>, vector<16x128xf32> -> vector<16x128xf32>
    %170 = arith.addf %167, %169 : vector<16x128xf32>
    %171 = math.tanh %170 : vector<16x128xf32>
    %172 = arith.truncf %171 : vector<16x128xf32> to vector<16x128xbf16>
    %c48_130 = arith.constant 48 : index
    %c0_131 = arith.constant 0 : index
    %173 = vector.load %arg9[%c48_130, %c0_131] : memref<128x128xbf16, #tpu.memory_space<vmem>>, vector<16x128xbf16>
    tpu.vector_store %arg9[%c48_130, %c0_131], %172 {strides = array<i32>} : memref<128x128xbf16, #tpu.memory_space<vmem>>, vector<16x128xbf16>,
    %c64_132 = arith.constant 64 : index
    %c0_133 = arith.constant 0 : index
    %174 = vector.load %arg10[%c64_132, %c0_133] : memref<128x128xf32, #tpu.memory_space<vmem>>, vector<16x128xf32>
    %175 = arith.truncf %171 : vector<16x128xf32> to vector<16x128xbf16>
    %cst_134 = arith.constant dense<0.000000e+00> : vector<16x128xf32>
    %176 = tpu.matmul %175, %144, %cst_134 {dimension_numbers = #tpu.dot_dimension_numbers<[1], [0], [0], [1], [0, 0, 1, 1], [], []>} : vector<16x128xbf16>, vector<128x128xbf16>, vector<16x128xf32> -> vector<16x128xf32>
    %177 = arith.addf %174, %176 : vector<16x128xf32>
    %178 = math.tanh %177 : vector<16x128xf32>
    %179 = arith.truncf %178 : vector<16x128xf32> to vector<16x128xbf16>
    %c64_135 = arith.constant 64 : index
    %c0_136 = arith.constant 0 : index
    %180 = vector.load %arg9[%c64_135, %c0_136] : memref<128x128xbf16, #tpu.memory_space<vmem>>, vector<16x128xbf16>
    tpu.vector_store %arg9[%c64_135, %c0_136], %179 {strides = array<i32>} : memref<128x128xbf16, #tpu.memory_space<vmem>>, vector<16x128xbf16>,
    %c80_137 = arith.constant 80 : index
    %c0_138 = arith.constant 0 : index
    %181 = vector.load %arg10[%c80_137, %c0_138] : memref<128x128xf32, #tpu.memory_space<vmem>>, vector<16x128xf32>
    %182 = arith.truncf %178 : vector<16x128xf32> to vector<16x128xbf16>
    %cst_139 = arith.constant dense<0.000000e+00> : vector<16x128xf32>
    %183 = tpu.matmul %182, %144, %cst_139 {dimension_numbers = #tpu.dot_dimension_numbers<[1], [0], [0], [1], [0, 0, 1, 1], [], []>} : vector<16x128xbf16>, vector<128x128xbf16>, vector<16x128xf32> -> vector<16x128xf32>
    %184 = arith.addf %181, %183 : vector<16x128xf32>
    %185 = math.tanh %184 : vector<16x128xf32>
    %186 = arith.truncf %185 : vector<16x128xf32> to vector<16x128xbf16>
    %c80_140 = arith.constant 80 : index
    %c0_141 = arith.constant 0 : index
    %187 = vector.load %arg9[%c80_140, %c0_141] : memref<128x128xbf16, #tpu.memory_space<vmem>>, vector<16x128xbf16>
    tpu.vector_store %arg9[%c80_140, %c0_141], %186 {strides = array<i32>} : memref<128x128xbf16, #tpu.memory_space<vmem>>, vector<16x128xbf16>,
    %c96_142 = arith.constant 96 : index
    %c0_143 = arith.constant 0 : index
    %188 = vector.load %arg10[%c96_142, %c0_143] : memref<128x128xf32, #tpu.memory_space<vmem>>, vector<16x128xf32>
    %189 = arith.truncf %185 : vector<16x128xf32> to vector<16x128xbf16>
    %cst_144 = arith.constant dense<0.000000e+00> : vector<16x128xf32>
    %190 = tpu.matmul %189, %144, %cst_144 {dimension_numbers = #tpu.dot_dimension_numbers<[1], [0], [0], [1], [0, 0, 1, 1], [], []>} : vector<16x128xbf16>, vector<128x128xbf16>, vector<16x128xf32> -> vector<16x128xf32>
    %191 = arith.addf %188, %190 : vector<16x128xf32>
    %192 = math.tanh %191 : vector<16x128xf32>
    %193 = arith.truncf %192 : vector<16x128xf32> to vector<16x128xbf16>
    %c96_145 = arith.constant 96 : index
    %c0_146 = arith.constant 0 : index
    %194 = vector.load %arg9[%c96_145, %c0_146] : memref<128x128xbf16, #tpu.memory_space<vmem>>, vector<16x128xbf16>
    tpu.vector_store %arg9[%c96_145, %c0_146], %193 {strides = array<i32>} : memref<128x128xbf16, #tpu.memory_space<vmem>>, vector<16x128xbf16>,
    %c112_147 = arith.constant 112 : index
    %c0_148 = arith.constant 0 : index
    %195 = vector.load %arg10[%c112_147, %c0_148] : memref<128x128xf32, #tpu.memory_space<vmem>>, vector<16x128xf32>
    %196 = arith.truncf %192 : vector<16x128xf32> to vector<16x128xbf16>
    %cst_149 = arith.constant dense<0.000000e+00> : vector<16x128xf32>
    %197 = tpu.matmul %196, %144, %cst_149 {dimension_numbers = #tpu.dot_dimension_numbers<[1], [0], [0], [1], [0, 0, 1, 1], [], []>} : vector<16x128xbf16>, vector<128x128xbf16>, vector<16x128xf32> -> vector<16x128xf32>
    %198 = arith.addf %195, %197 : vector<16x128xf32>
    %199 = math.tanh %198 : vector<16x128xf32>
    %200 = arith.truncf %199 : vector<16x128xf32> to vector<16x128xbf16>
    %c112_150 = arith.constant 112 : index
    %c0_151 = arith.constant 0 : index
    %201 = vector.load %arg9[%c112_150, %c0_151] : memref<128x128xbf16, #tpu.memory_space<vmem>>, vector<16x128xbf16>
    tpu.vector_store %arg9[%c112_150, %c0_151], %200 {strides = array<i32>} : memref<128x128xbf16, #tpu.memory_space<vmem>>, vector<16x128xbf16>,
    %c0_152 = arith.constant 0 : index
    %c0_153 = arith.constant 0 : index
    %202 = vector.load %arg9[%c0_152, %c0_153] : memref<128x128xbf16, #tpu.memory_space<vmem>>, vector<128x128xbf16>
    %c0_154 = arith.constant 0 : index
    %c0_155 = arith.constant 0 : index
    %203 = vector.load %arg6[%c0_154, %c0_155] : memref<128x128xbf16, #tpu.memory_space<vmem>>, vector<128x128xbf16>
    %cst_156 = arith.constant dense<0.000000e+00> : vector<128x128xf32>
    %204 = tpu.matmul %202, %203, %cst_156 {dimension_numbers = #tpu.dot_dimension_numbers<[1], [0], [0], [1], [0, 0, 1, 1], [], []>} : vector<128x128xbf16>, vector<128x128xbf16>, vector<128x128xf32> -> vector<128x128xf32>
    %c0_157 = arith.constant 0 : index
    %c0_158 = arith.constant 0 : index
    %205 = vector.load %arg7[%c0_157, %c0_158] : memref<1x128xf32, #tpu.memory_space<vmem>>, vector<1x128xf32>
    %206 = vector.broadcast %205 : vector<1x128xf32> to vector<128x128xf32>
    %207 = arith.addf %204, %206 : vector<128x128xf32>
    %c0_159 = arith.constant 0 : index
    %c0_160 = arith.constant 0 : index
    %208 = vector.load %arg8[%c0_159, %c0_160] : memref<128x128xf32, #tpu.memory_space<vmem>>, vector<128x128xf32>
    tpu.vector_store %arg8[%c0_159, %c0_160], %207 {strides = array<i32>} : memref<128x128xf32, #tpu.memory_space<vmem>>, vector<128x128xf32>,
    return
  }
}

</mosaic_0001>

<bundles_post_ra>
// kernel: basemodel_forward.1
= control target key start
LH: loop header
LB: loop body
LE: loop exit
PB: predicated region body
PF: predicated region fallthrough
CT: control target
= control target key end

     0   :  { %13 = vsyncpa [#allocation5], 0  ;;  %s3039_s0 = inlined_call_operand.vmem [shape: bf16[128,128], index: 0, kind: input, shape index: {}]   ;;  %s3040_s1 = inlined_call_operand.vmem [shape: bf16[128,128], index: 1, kind: input, shape index: {}]   ;;  %s3041_s2 = inlined_call_operand.vmem [shape: f32[1,128], index: 2, kind: input, shape index: {}]   ;;  %s3042_s3 = inlined_call_operand.hbm [shape: bf16[3,128,128], index: 3, kind: input, shape index: {}]   ;;  %s3043_s4 = inlined_call_operand.vmem [shape: f32[3,1,128], index: 4, kind: input, shape index: {}]   ;;  %s3044_s5 = inlined_call_operand.hbm [shape: bf16[3,128,128], index: 5, kind: input, shape index: {}]   ;;  %s3045_s6 = inlined_call_operand.hbm [shape: bf16[128,128], index: 6, kind: input, shape index: {}]   ;;  %s3046_s7 = inlined_call_operand.vmem [shape: f32[1,128], index: 7, kind: input, shape index: {}]   ;;  %s3047_s8 = inlined_call_operand.vmem [shape: f32[128,128], index: 8, kind: output, shape index: {}]  }
   0x1   :  { %14 = vsyncpa [#allocation7], 0  ;;  %s40_s29 = sshll.u32 %s3044_s5, 4  ;;  %s2544_s30 = smov [#allocation6]   ;;  %s41_s29 = int_to_ptr.hbm [resolvable:$true] %s40_s29 }
   0x2   :  { %s42_s9 = sshll.u32 %s2544_s30, 4  ;;  %s25_s12 = sshll.u32 %s3042_s3, 4  ;;  %s43_s9 = int_to_ptr.vmem [resolvable:$true] %s42_s9  ;;  %s26_s12 = int_to_ptr.hbm [resolvable:$true] %s25_s12 }
   0x3   :  { %s2545_s13 = smov 64   ;;  %s2546_s14 = smov 4  }
   0x4   :  { %48 = dma.hbm_to_vmem [thread:$0]  %s41_s29, 3072, %s43_s9, [#allocation7], %s2545_s13, %s2545_s13, %s2546_s14  }
   0x5   :  { %s2547_s15 = smov [#allocation4]   ;;  %s53_s19 = sshll.u32 %s3045_s6, 4  ;;  %s54_s19 = int_to_ptr.hbm [resolvable:$true] %s53_s19 }
   0x6   :  { %s27_s16 = sshll.u32 %s2547_s15, 4  ;;  %s2548_s5 = smov [#allocation8]   ;;  %s28_s16 = int_to_ptr.vmem [resolvable:$true] %s27_s16 }
   0x7   :  { %33 = dma.hbm_to_vmem [thread:$0]  %s26_s12, 3072, %s28_s16, [#allocation5], %s2545_s13, %s2545_s13, %s2546_s14  }
   0x8   :  { %s55_s20 = sshll.u32 %s2548_s5, 4  ;;  %s56_s20 = int_to_ptr.vmem [resolvable:$true] %s55_s20 }
   0x9   :  { %61 = dma.hbm_to_vmem [thread:$0]  %s54_s19, 1024, %s56_s20, [#allocation7], %s2545_s13, %s2545_s13, %s2546_s14  }
   0xa   :  { %2540 = dma.done.wait [#allocation5], 3072  }
   0xb   :  { %2541 = vsyncadd [#allocation5], 4294964224 }
   0xc   :  { %2542 = dma.done.wait [#allocation7], 4096  }
   0xd   :  { %2543 = vsyncadd [#allocation7], 4294963200  ;;  %v2140_v0 = vld [vmem:[%s3040_s1 + $0x38] sm:$0xff]  ;;  %v2139_v2 = vld [vmem:[%s3040_s1 + $0x30] sm:$0xff]  ;;  %v2549_v17 = vmov 0  }
   0xe   :  { %v2607_v1 = vld [vmem:[#allocation6 + $0x38] sm:$0xff]  ;;  %209 = vmatpush.bf16.msra.mxu0 %v2140_v0  ;;  %v2613_v3 = vld [vmem:[#allocation6 + $0x30] sm:$0xff]  ;;  %v2138_v4 = vld [vmem:[%s3040_s1 + $0x28] sm:$0xff] }
   0xf   :  { %340 = vmatpush.bf16.msra.mxu2 %v2607_v1  ;;  %400 = vmatpush.bf16.msra.mxu3 %v2607_v1  ;;  %v2621_v5 = vld [vmem:[#allocation6 + $0x28] sm:$0xff]  ;;  %v2137_v6 = vld [vmem:[%s3040_s1 + $0x20] sm:$0xff]  ;;  %v2136_v8 = vld [vmem:[%s3040_s1 + $0x18] sm:$0xff] }
  0x10   :  { %430 = vmatpush.bf16.msra.mxu1 %v2607_v1  ;;  %v2629_v7 = vld [vmem:[#allocation6 + $0x20] sm:$0xff]  ;;  %v2637_v9 = vld [vmem:[#allocation6 + $0x18] sm:$0xff]  ;;  %v2135_v10 = vld [vmem:[%s3040_s1 + $0x10] sm:$0xff] }
  0x11   :  { %v2645_v11 = vld [vmem:[#allocation6 + $0x10] sm:$0xff]  ;;  %v2134_v12 = vld [vmem:[%s3040_s1 + $0x8] sm:$0xff]  ;;  %v2133_v14 = vld [vmem:[%s3040_s1] sm:$0xff] }
  0x12   :  { %210 = vmatpush.bf16.msra.mxu0 %v2139_v2  ;;  %v2653_v13 = vld [vmem:[#allocation6 + $0x8] sm:$0xff]  ;;  %v2661_v15 = vld [vmem:[#allocation6] sm:$0xff]  ;;  %v2127_v36 = vld [vmem:[%s3039_s0 + $0x10] sm:$0xff] }
  0x13   :  { %341 = vmatpush.bf16.msra.mxu2 %v2613_v3  ;;  %401 = vmatpush.bf16.msra.mxu3 %v2613_v3  ;;  %v2125_v16 = vld [vmem:[%s3039_s0] sm:$0xff]  ;;  %v2126_v18 = vld [vmem:[%s3039_s0 + $0x8] sm:$0xff]  ;;  %v2128_v53 = vld [vmem:[%s3039_s0 + $0x18] sm:$0xff] }
  0x14   :  { %431 = vmatpush.bf16.msra.mxu1 %v2613_v3  ;;  %v2710_v20 = vld [vmem:[%s3041_s2] ss:$0 sm:$0xff] }
  0x16   :  { %211 = vmatpush.bf16.msra.mxu0 %v2138_v4 }
  0x17   :  { %342 = vmatpush.bf16.msra.mxu2 %v2621_v5  ;;  %402 = vmatpush.bf16.msra.mxu3 %v2621_v5 }
  0x18   :  { %432 = vmatpush.bf16.msra.mxu1 %v2621_v5 }
  0x1a   :  { %212 = vmatpush.bf16.msra.mxu0 %v2137_v6  ;;  %v2129_v6 = vld [vmem:[%s3039_s0 + $0x20] sm:$0xff] }
  0x1b   :  { %343 = vmatpush.bf16.msra.mxu2 %v2629_v7  ;;  %403 = vmatpush.bf16.msra.mxu3 %v2629_v7 }
  0x1c   :  { %433 = vmatpush.bf16.msra.mxu1 %v2629_v7 }
  0x1e   :  { %213 = vmatpush.bf16.msra.mxu0 %v2136_v8 }
  0x1f   :  { %344 = vmatpush.bf16.msra.mxu2 %v2637_v9  ;;  %404 = vmatpush.bf16.msra.mxu3 %v2637_v9 }
  0x20   :  { %434 = vmatpush.bf16.msra.mxu1 %v2637_v9 }
  0x22   :  { %214 = vmatpush.bf16.msra.mxu0 %v2135_v10 }
  0x23   :  { %345 = vmatpush.bf16.msra.mxu2 %v2645_v11  ;;  %405 = vmatpush.bf16.msra.mxu3 %v2645_v11 }
  0x24   :  { %435 = vmatpush.bf16.msra.mxu1 %v2645_v11 }
  0x26   :  { %215 = vmatpush.bf16.msra.mxu0 %v2134_v12 }
  0x27   :  { %346 = vmatpush.bf16.msra.mxu2 %v2653_v13  ;;  %406 = vmatpush.bf16.msra.mxu3 %v2653_v13 }
  0x28   :  { %436 = vmatpush.bf16.msra.mxu1 %v2653_v13 }
  0x2a   :  { %216 = vmatpush.bf16.msra.mxu0 %v2133_v14 }
  0x2b   :  { %347 = vmatpush.bf16.msra.mxu2 %v2661_v15  ;;  %407 = vmatpush.bf16.msra.mxu3 %v2661_v15 }
  0x2c   :  { %437 = vmatpush.bf16.msra.mxu1 %v2661_v15 }
  0x2d   :  { %217 = vmatmul.bf16.vlgmr.msra.gmra.mxu0 %v2125_v16 }
  0x2e   :  { %348 = vmatmul.bf16.vlgmr.msra.gmra.mxu2 %v2549_v17 }
  0x2f   :  { %370 = vmatpush.bf16.msrb.mxu2 %v2607_v1  ;;  %490 = vmatpush.bf16.msrb.mxu3 %v2607_v1 }
  0x30   :  { %520 = vmatpush.bf16.msrb.mxu1 %v2607_v1 }
  0x33   :  { %371 = vmatpush.bf16.msrb.mxu2 %v2613_v3  ;;  %491 = vmatpush.bf16.msrb.mxu3 %v2613_v3 }
  0x34   :  { %521 = vmatpush.bf16.msrb.mxu1 %v2613_v3 }
  0x37   :  { %372 = vmatpush.bf16.msrb.mxu2 %v2621_v5  ;;  %492 = vmatpush.bf16.msrb.mxu3 %v2621_v5 }
  0x38   :  { %522 = vmatpush.bf16.msrb.mxu1 %v2621_v5 }
  0x3b   :  { %373 = vmatpush.bf16.msrb.mxu2 %v2629_v7  ;;  %493 = vmatpush.bf16.msrb.mxu3 %v2629_v7 }
  0x3c   :  { %523 = vmatpush.bf16.msrb.mxu1 %v2629_v7 }
  0x3d   :  { %222 = vmatmul.bf16.gmra.mxu0 %v2126_v18 }
  0x3f   :  { %374 = vmatpush.bf16.msrb.mxu2 %v2637_v9  ;;  %494 = vmatpush.bf16.msrb.mxu3 %v2637_v9 }
  0x40   :  { %524 = vmatpush.bf16.msrb.mxu1 %v2637_v9 }
  0x43   :  { %375 = vmatpush.bf16.msrb.mxu2 %v2645_v11  ;;  %495 = vmatpush.bf16.msrb.mxu3 %v2645_v11 }
  0x44   :  { %525 = vmatpush.bf16.msrb.mxu1 %v2645_v11 }
  0x47   :  { %376 = vmatpush.bf16.msrb.mxu2 %v2653_v13  ;;  %496 = vmatpush.bf16.msrb.mxu3 %v2653_v13 }
  0x48   :  { %526 = vmatpush.bf16.msrb.mxu1 %v2653_v13 }
  0x4b   :  { %377 = vmatpush.bf16.msrb.mxu2 %v2661_v15  ;;  %497 = vmatpush.bf16.msrb.mxu3 %v2661_v15 }
  0x4c   :  { %527 = vmatpush.bf16.msrb.mxu1 %v2661_v15 }
  0x4d   :  { %227 = vmatmul.bf16.gmra.mxu0 %v2127_v36  ;;  %v2157_v36 = vld [vmem:[#allocation4 + $0x40] sm:$0xff] }
  0x4f   :  { %460 = vmatpush.bf16.msra.mxu2 %v2607_v1 }
  0x53   :  { %461 = vmatpush.bf16.msra.mxu2 %v2613_v3 }
  0x57   :  { %462 = vmatpush.bf16.msra.mxu2 %v2621_v5 }
  0x5b   :  { %463 = vmatpush.bf16.msra.mxu2 %v2629_v7 }
  0x5d   :  { %232 = vmatmul.bf16.gmra.mxu0 %v2128_v53 }
  0x5f   :  { %464 = vmatpush.bf16.msra.mxu2 %v2637_v9 }
  0x63   :  { %465 = vmatpush.bf16.msra.mxu2 %v2645_v11 }
  0x67   :  { %466 = vmatpush.bf16.msra.mxu2 %v2653_v13 }
  0x6b   :  { %467 = vmatpush.bf16.msra.mxu2 %v2661_v15 }
  0x6d   :  { %237 = vmatmul.bf16.gmra.mxu0 %v2129_v6  ;;  %v2755_v6 = vld [vmem:[#allocation6 + $0x68] sm:$0xff] }
  0xaa   :  { %v218_v19 = vpop.f32.mrf.mxu0 }
  0xab   :  { %v219_v21 = vadd.f32 %v2710_v20, %v218_v19 }
  0xb1   :  { %v349_v22 = vpop.f32.mrf.mxu2 }
  0xb2   :  { %v354_v23 = vadd.f32 %v349_v22, %v219_v21  ;;  %v220_v24 = vpop.f32.mrf.mxu0 }
  0xb3   :  { %v221_v25 = vadd.f32 %v2710_v20, %v220_v24 }
  0xb4   :  { %2372 = vtanh.f32 %v354_v23 }
  0xb9   :  { %v351_v26 = vpop.f32.mrf.mxu2 }
  0xba   :  { %v355_v27 = vadd.f32 %v351_v26, %v221_v25  ;;  %v2373_v28 = vpop.eup %2372  ;;  %v223_v37 = vpop.f32.mrf.mxu0  ;;  %v2164_v25 = vld [vmem:[#allocation4 + $0x78] sm:$0xff]  ;;  %v2163_v26 = vld [vmem:[#allocation4 + $0x70] sm:$0xff] }
  0xbb   :  { %v358_v29 = vpack.c.bf16 %v2373_v28, %v2373_v28  ;;  %v224_v38 = vadd.f32 %v2710_v20, %v223_v37 }
  0xbc   :  { %2374 = vtanh.f32 %v355_v27  ;;  %v2162_v27 = vld [vmem:[#allocation4 + $0x68] sm:$0xff] }
  0xbd   :  { %v366_v33 = vunpack.c.l.b16 %v358_v29  ;;  %v2161_v29 = vld [vmem:[#allocation4 + $0x60] sm:$0xff] }
  0xc2   :  { %v2375_v30 = vpop.eup %2374  ;;  %v225_v41 = vpop.f32.mrf.mxu0 }
  0xc3   :  { %v2216_v31 = vpack.c.bf16 %v2375_v30, %v2373_v28  ;;  %v359_v32 = vpack.c.bf16 %v2375_v30, %v2375_v30  ;;  %v226_v42 = vadd.f32 %v2710_v20, %v225_v41  ;;  %v2130_v28 = vld [vmem:[%s3039_s0 + $0x28] sm:$0xff]  ;;  %v2160_v30 = vld [vmem:[#allocation4 + $0x58] sm:$0xff] }
  0xc4   :  { %242 = vmatmul.bf16.gmra.mxu0 %v2130_v28 }
  0xc5   :  { %2217 = vst [vmem:[#allocation2 + $0x30] sm:$0xff] %v2216_v31   ;;  %v367_v34 = vunpack.c.l.b16 %v359_v32  ;;  %v2159_v31 = vld [vmem:[#allocation4 + $0x50] sm:$0xff] }
  0xc7   :  { %v368_v35 = vpack.c.b16 %v367_v34, %v366_v33  ;;  %v2158_v33 = vld [vmem:[#allocation4 + $0x48] sm:$0xff] }
  0xc9   :  { %378 = vmatmul.bf16.vlgmr.msrb.gmra.mxu2 %v368_v35 }
  0xca   :  { %550 = vmatpush.bf16.msrb.mxu2 %v2607_v1  ;;  %v228_v54 = vpop.f32.mrf.mxu0 }
  0xcb   :  { %v229_v55 = vadd.f32 %v2710_v20, %v228_v54 }
  0xce   :  { %551 = vmatpush.bf16.msrb.mxu2 %v2613_v3 }
  0xd2   :  { %552 = vmatpush.bf16.msrb.mxu2 %v2621_v5  ;;  %v230_v58 = vpop.f32.mrf.mxu0 }
  0xd3   :  { %v231_v59 = vadd.f32 %v2710_v20, %v230_v58 }
  0xd6   :  { %553 = vmatpush.bf16.msrb.mxu2 %v2629_v7 }
  0xda   :  { %554 = vmatpush.bf16.msrb.mxu2 %v2637_v9  ;;  %v233_v7 = vpop.f32.mrf.mxu0 }
  0xdb   :  { %v234_v8 = vadd.f32 %v2710_v20, %v233_v7 }
  0xde   :  { %555 = vmatpush.bf16.msrb.mxu2 %v2645_v11 }
  0xe2   :  { %556 = vmatpush.bf16.msrb.mxu2 %v2653_v13  ;;  %v235_v11 = vpop.f32.mrf.mxu0 }
  0xe3   :  { %v236_v12 = vadd.f32 %v2710_v20, %v235_v11  ;;  %v2770_v11 = vld [vmem:[#allocation6 + $0x50] sm:$0xff] }
  0xe6   :  { %557 = vmatpush.bf16.msrb.mxu2 %v2661_v15 }
  0xea   :  { %v238_v32 = vpop.f32.mrf.mxu0 }
  0xeb   :  { %v239_v34 = vadd.f32 %v2710_v20, %v238_v32 }
 0x14c   :  { %v379_v39 = vpop.f32.mrf.mxu2 }
 0x14d   :  { %v384_v40 = vadd.f32 %v379_v39, %v224_v38  ;;  %v240_v38 = vpop.f32.mrf.mxu0 }
 0x14e   :  { %v241_v39 = vadd.f32 %v2710_v20, %v240_v38 }
 0x14f   :  { %2376 = vtanh.f32 %v384_v40 }
 0x154   :  { %v381_v43 = vpop.f32.mrf.mxu2 }
 0x155   :  { %v385_v44 = vadd.f32 %v381_v43, %v226_v42  ;;  %v2377_v45 = vpop.eup %2376 }
 0x156   :  { %v388_v46 = vpack.c.bf16 %v2377_v45, %v2377_v45 }
 0x157   :  { %2378 = vtanh.f32 %v385_v44 }
 0x158   :  { %v396_v50 = vunpack.c.l.b16 %v388_v46 }
 0x15d   :  { %v2379_v47 = vpop.eup %2378 }
 0x15e   :  { %v2221_v48 = vpack.c.bf16 %v2379_v47, %v2377_v45  ;;  %v389_v49 = vpack.c.bf16 %v2379_v47, %v2379_v47 }
 0x160   :  { %2333 = vst [vmem:[#allocation2] sm:$0xff] %v2221_v48   ;;  %v397_v51 = vunpack.c.l.b16 %v389_v49 }
 0x162   :  { %v398_v52 = vpack.c.b16 %v397_v51, %v396_v50  ;;  %v2131_v51 = vld [vmem:[%s3039_s0 + $0x30] sm:$0xff] }
 0x163   :  { %247 = vmatmul.bf16.gmra.mxu0 %v2131_v51 }
 0x164   :  { %408 = vmatmul.bf16.vlgmr.msra.gmra.mxu3 %v398_v52  ;;  %v243_v52 = vpop.f32.mrf.mxu0 }
 0x165   :  { %2354 = vmatpush.bf16.msra.mxu3 %v2164_v25  ;;  %v244_v53 = vadd.f32 %v2710_v20, %v243_v52 }
 0x169   :  { %2355 = vmatpush.bf16.msra.mxu3 %v2163_v26 }
 0x16d   :  { %2356 = vmatpush.bf16.msra.mxu3 %v2162_v27 }
 0x171   :  { %2357 = vmatpush.bf16.msra.mxu3 %v2161_v29 }
 0x175   :  { %2358 = vmatpush.bf16.msra.mxu3 %v2160_v30 }
 0x179   :  { %2359 = vmatpush.bf16.msra.mxu3 %v2159_v31 }
 0x17d   :  { %2360 = vmatpush.bf16.msra.mxu3 %v2158_v33 }
 0x181   :  { %2361 = vmatpush.bf16.msra.mxu3 %v2157_v36 }
 0x1e7   :  { %v409_v56 = vpop.f32.mrf.mxu3 }
 0x1e8   :  { %v414_v57 = vadd.f32 %v409_v56, %v229_v55  ;;  %v245_v56 = vpop.f32.mrf.mxu0 }
 0x1ea   :  { %2380 = vtanh.f32 %v414_v57  ;;  %v246_v57 = vadd.f32 %v2710_v20, %v245_v56 }
 0x1ef   :  { %v411_v60 = vpop.f32.mrf.mxu3 }
 0x1f0   :  { %v415_v61 = vadd.f32 %v411_v60, %v231_v59  ;;  %v2381_v62 = vpop.eup %2380  ;;  %v2747_v59 = vld [vmem:[#allocation6 + $0x78] sm:$0xff] }
 0x1f1   :  { %v418_v63 = vpack.c.bf16 %v2381_v62, %v2381_v62  ;;  %898 = vmatpush.bf16.msrb.mxu0 %v2747_v59 }
 0x1f2   :  { %2382 = vtanh.f32 %v415_v61  ;;  %v2751_v61 = vld [vmem:[#allocation6 + $0x70] sm:$0xff] }
 0x1f3   :  { %v426_v3 = vunpack.c.l.b16 %v418_v63 }
 0x1f5   :  { %899 = vmatpush.bf16.msrb.mxu0 %v2751_v61 }
 0x1f8   :  { %v2383_v0 = vpop.eup %2382 }
 0x1f9   :  { %v2226_v1 = vpack.c.bf16 %v2383_v0, %v2381_v62  ;;  %v419_v2 = vpack.c.bf16 %v2383_v0, %v2383_v0  ;;  %900 = vmatpush.bf16.msrb.mxu0 %v2755_v6 }
 0x1fb   :  { %2334 = vst [vmem:[#allocation2 + $0x18] sm:$0xff] %v2226_v1   ;;  %v427_v4 = vunpack.c.l.b16 %v419_v2 }
 0x1fd   :  { %v428_v5 = vpack.c.b16 %v427_v4, %v426_v3 }
 0x1ff   :  { %438 = vmatmul.bf16.vlgmr.msra.gmra.mxu1 %v428_v5 }
 0x200   :  { %706 = vmatpush.bf16.msra.mxu1 %v2164_v25 }
 0x204   :  { %707 = vmatpush.bf16.msra.mxu1 %v2163_v26 }
 0x208   :  { %708 = vmatpush.bf16.msra.mxu1 %v2162_v27 }
 0x20c   :  { %709 = vmatpush.bf16.msra.mxu1 %v2161_v29 }
 0x210   :  { %710 = vmatpush.bf16.msra.mxu1 %v2160_v30 }
 0x214   :  { %711 = vmatpush.bf16.msra.mxu1 %v2159_v31 }
 0x218   :  { %712 = vmatpush.bf16.msra.mxu1 %v2158_v33 }
 0x21c   :  { %713 = vmatpush.bf16.msra.mxu1 %v2157_v36 }
 0x27c   :  { %v439_v9 = vpop.f32.mrf.mxu1 }
 0x27d   :  { %v444_v10 = vadd.f32 %v439_v9, %v234_v8  ;;  %v2760_v8 = vld [vmem:[#allocation6 + $0x60] sm:$0xff]  ;;  %v2149_v9 = vld [vmem:[#allocation2 + $0x30] sm:$0xff] }
 0x27e   :  { %901 = vmatpush.bf16.msrb.mxu0 %v2760_v8 }
 0x27f   :  { %2384 = vtanh.f32 %v444_v10  ;;  %v2767_v10 = vld [vmem:[#allocation6 + $0x58] sm:$0xff] }
 0x282   :  { %902 = vmatpush.bf16.msrb.mxu0 %v2767_v10 }
 0x284   :  { %v441_v13 = vpop.f32.mrf.mxu1 }
 0x285   :  { %v445_v14 = vadd.f32 %v441_v13, %v236_v12  ;;  %v2385_v15 = vpop.eup %2384  ;;  %v2150_v12 = vld [vmem:[#allocation2] sm:$0xff]  ;;  %v2777_v13 = vld [vmem:[#allocation6 + $0x48] sm:$0xff] }
 0x286   :  { %v448_v16 = vpack.c.bf16 %v2385_v15, %v2385_v15  ;;  %903 = vmatpush.bf16.msrb.mxu0 %v2770_v11 }
 0x287   :  { %2386 = vtanh.f32 %v445_v14  ;;  %v2780_v14 = vld [vmem:[#allocation6 + $0x40] sm:$0xff] }
 0x288   :  { %v456_v22 = vunpack.c.l.b16 %v448_v16 }
 0x28a   :  { %904 = vmatpush.bf16.msrb.mxu0 %v2777_v13 }
 0x28d   :  { %v2387_v18 = vpop.eup %2386 }
 0x28e   :  { %v449_v19 = vpack.c.bf16 %v2387_v18, %v2387_v18  ;;  %v2231_v21 = vpack.c.bf16 %v2387_v18, %v2385_v15  ;;  %905 = vmatpush.bf16.msrb.mxu0 %v2780_v14  ;;  %v2151_v15 = vld [vmem:[#allocation2 + $0x18] sm:$0xff]  ;;  %v248_v18 = vpop.f32.mrf.mxu0 }
 0x290   :  { %2335 = vst [vmem:[#allocation2 + $0x10] sm:$0xff] %v2231_v21   ;;  %v457_v23 = vunpack.c.l.b16 %v449_v19  ;;  %v2132_v19 = vld [vmem:[%s3039_s0 + $0x38] sm:$0xff]  ;;  %v249_v21 = vadd.f32 %v2710_v20, %v248_v18 }
 0x291   :  { %252 = vmatmul.bf16.gmra.mxu0 %v2132_v19 }
 0x292   :  { %v458_v24 = vpack.c.b16 %v457_v23, %v456_v22  ;;  %988 = vmatpush.bf16.msra.mxu0 %v2747_v59 }
 0x294   :  { %468 = vmatmul.bf16.vlgmr.msra.gmra.mxu2 %v458_v24 }
 0x295   :  { %868 = vmatpush.bf16.msra.mxu2 %v2747_v59 }
 0x296   :  { %989 = vmatpush.bf16.msra.mxu0 %v2751_v61  ;;  %v250_v23 = vpop.f32.mrf.mxu0 }
 0x297   :  { %v2152_v16 = vld [vmem:[#allocation2 + $0x10] sm:$0xff]  ;;  %v251_v25 = vadd.f32 %v2710_v20, %v250_v23 }
 0x299   :  { %869 = vmatpush.bf16.msra.mxu2 %v2751_v61 }
 0x29a   :  { %990 = vmatpush.bf16.msra.mxu0 %v2755_v6 }
 0x29d   :  { %870 = vmatpush.bf16.msra.mxu2 %v2755_v6 }
 0x29e   :  { %991 = vmatpush.bf16.msra.mxu0 %v2760_v8 }
 0x2a1   :  { %871 = vmatpush.bf16.msra.mxu2 %v2760_v8 }
 0x2a2   :  { %992 = vmatpush.bf16.msra.mxu0 %v2767_v10 }
 0x2a5   :  { %872 = vmatpush.bf16.msra.mxu2 %v2767_v10 }
 0x2a6   :  { %993 = vmatpush.bf16.msra.mxu0 %v2770_v11 }
 0x2a9   :  { %873 = vmatpush.bf16.msra.mxu2 %v2770_v11 }
 0x2aa   :  { %994 = vmatpush.bf16.msra.mxu0 %v2777_v13 }
 0x2ad   :  { %874 = vmatpush.bf16.msra.mxu2 %v2777_v13 }
 0x2ae   :  { %995 = vmatpush.bf16.msra.mxu0 %v2780_v14 }
 0x2b1   :  { %875 = vmatpush.bf16.msra.mxu2 %v2780_v14 }
 0x317   :  { %v469_v35 = vpop.f32.mrf.mxu2 }
 0x318   :  { %v474_v37 = vadd.f32 %v469_v35, %v239_v34 }
 0x31a   :  { %2388 = vtanh.f32 %v474_v37 }
 0x31f   :  { %v471_v40 = vpop.f32.mrf.mxu2 }
 0x320   :  { %v475_v41 = vadd.f32 %v471_v40, %v241_v39  ;;  %v2389_v42 = vpop.eup %2388 }
 0x321   :  { %v478_v43 = vpack.c.bf16 %v2389_v42, %v2389_v42 }
 0x322   :  { %2390 = vtanh.f32 %v475_v41 }
 0x323   :  { %v486_v47 = vunpack.c.l.b16 %v478_v43 }
 0x328   :  { %v2391_v44 = vpop.eup %2390 }
 0x329   :  { %v2236_v45 = vpack.c.bf16 %v2391_v44, %v2389_v42  ;;  %v479_v46 = vpack.c.bf16 %v2391_v44, %v2391_v44 }
 0x32b   :  { %2336 = vst [vmem:[#allocation2 + $0x8] sm:$0xff] %v2236_v45   ;;  %v487_v48 = vunpack.c.l.b16 %v479_v46  ;;  %v2836_v45 = vld [vmem:[%s3043_s4 + $0x1] ss:$0 sm:$0xff] }
 0x32d   :  { %v488_v49 = vpack.c.b16 %v487_v48, %v486_v47 }
 0x32f   :  { %498 = vmatmul.bf16.vlgmr.msrb.gmra.mxu3 %v488_v49 }
 0x332   :  { %v2153_v50 = vld [vmem:[#allocation2 + $0x8] sm:$0xff] }
 0x33f   :  { %734 = vmatmul.bf16.vlgmr.msra.gmra.mxu3 %v2153_v50 }
 0x3b2   :  { %v499_v54 = vpop.f32.mrf.mxu3 }
 0x3b3   :  { %v504_v55 = vadd.f32 %v499_v54, %v244_v53 }
 0x3b5   :  { %2392 = vtanh.f32 %v504_v55 }
 0x3ba   :  { %v501_v58 = vpop.f32.mrf.mxu3 }
 0x3bb   :  { %v505_v60 = vadd.f32 %v501_v58, %v246_v57  ;;  %v2393_v62 = vpop.eup %2392 }
 0x3bc   :  { %v508_v63 = vpack.c.bf16 %v2393_v62, %v2393_v62 }
 0x3bd   :  { %2394 = vtanh.f32 %v505_v60 }
 0x3be   :  { %v516_v3 = vunpack.c.l.b16 %v508_v63 }
 0x3c3   :  { %v2395_v0 = vpop.eup %2394 }
 0x3c4   :  { %v2241_v1 = vpack.c.bf16 %v2395_v0, %v2393_v62  ;;  %v509_v2 = vpack.c.bf16 %v2395_v0, %v2395_v0  ;;  %v253_v62 = vpop.f32.mrf.mxu0 }
 0x3c5   :  { %v254_v0 = vadd.f32 %v2710_v20, %v253_v62 }
 0x3c6   :  { %2337 = vst [vmem:[#allocation2 + $0x20] sm:$0xff] %v2241_v1   ;;  %v517_v4 = vunpack.c.l.b16 %v509_v2 }
 0x3c8   :  { %v518_v5 = vpack.c.b16 %v517_v4, %v516_v3 }
 0x3ca   :  { %528 = vmatmul.bf16.vlgmr.msrb.gmra.mxu1 %v518_v5 }
 0x3cb   :  { %838 = vmatpush.bf16.msrb.mxu1 %v2747_v59 }
 0x3cc   :  { %v255_v1 = vpop.f32.mrf.mxu0 }
 0x3cd   :  { %v2154_v7 = vld [vmem:[#allocation2 + $0x20] sm:$0xff] }
 0x3ce   :  { %739 = vmatmul.bf16.gmra.mxu3 %v2154_v7 }
 0x3cf   :  { %839 = vmatpush.bf16.msrb.mxu1 %v2751_v61 }
 0x3d3   :  { %840 = vmatpush.bf16.msrb.mxu1 %v2755_v6 }
 0x3d7   :  { %841 = vmatpush.bf16.msrb.mxu1 %v2760_v8 }
 0x3da   :  { %714 = vmatmul.bf16.vlgmr.msra.gmra.mxu1 %v2149_v9 }
 0x3db   :  { %842 = vmatpush.bf16.msrb.mxu1 %v2767_v10 }
 0x3df   :  { %843 = vmatpush.bf16.msrb.mxu1 %v2770_v11 }
 0x3e3   :  { %844 = vmatpush.bf16.msrb.mxu1 %v2777_v13 }
 0x3e7   :  { %845 = vmatpush.bf16.msrb.mxu1 %v2780_v14 }
 0x3ea   :  { %719 = vmatmul.bf16.gmra.mxu1 %v2150_v12 }
 0x3eb   :  { %928 = vmatpush.bf16.msra.mxu1 %v2747_v59 }
 0x3ef   :  { %929 = vmatpush.bf16.msra.mxu1 %v2751_v61 }
 0x3f3   :  { %930 = vmatpush.bf16.msra.mxu1 %v2755_v6 }
 0x3f7   :  { %931 = vmatpush.bf16.msra.mxu1 %v2760_v8 }
 0x3fa   :  { %724 = vmatmul.bf16.gmra.mxu1 %v2151_v15 }
 0x3fb   :  { %932 = vmatpush.bf16.msra.mxu1 %v2767_v10 }
 0x3ff   :  { %933 = vmatpush.bf16.msra.mxu1 %v2770_v11 }
 0x403   :  { %934 = vmatpush.bf16.msra.mxu1 %v2777_v13 }
 0x407   :  { %935 = vmatpush.bf16.msra.mxu1 %v2780_v14 }
 0x40a   :  { %729 = vmatmul.bf16.gmra.mxu1 %v2152_v16 }
 0x41a   :  { %846 = vmatmul.bf16.vlgmr.msrb.gmra.mxu1 %v2549_v17 }
 0x41b   :  { %1018 = vmatpush.bf16.msrb.mxu1 %v2747_v59 }
 0x41f   :  { %1019 = vmatpush.bf16.msrb.mxu1 %v2751_v61 }
 0x423   :  { %1020 = vmatpush.bf16.msrb.mxu1 %v2755_v6 }
 0x427   :  { %1021 = vmatpush.bf16.msrb.mxu1 %v2760_v8 }
 0x42b   :  { %1022 = vmatpush.bf16.msrb.mxu1 %v2767_v10 }
 0x42f   :  { %1023 = vmatpush.bf16.msrb.mxu1 %v2770_v11 }
 0x433   :  { %1024 = vmatpush.bf16.msrb.mxu1 %v2777_v13 }
 0x437   :  { %1025 = vmatpush.bf16.msrb.mxu1 %v2780_v14 }
 0x447   :  { %v529_v22 = vpop.f32.mrf.mxu1 }
 0x448   :  { %v534_v24 = vadd.f32 %v529_v22, %v249_v21 }
 0x44a   :  { %2396 = vtanh.f32 %v534_v24 }
 0x44f   :  { %v531_v26 = vpop.f32.mrf.mxu1 }
 0x450   :  { %v535_v27 = vadd.f32 %v531_v26, %v251_v25  ;;  %v2397_v28 = vpop.eup %2396 }
 0x451   :  { %v538_v29 = vpack.c.bf16 %v2397_v28, %v2397_v28 }
 0x452   :  { %2398 = vtanh.f32 %v535_v27 }
 0x453   :  { %v546_v34 = vunpack.c.l.b16 %v538_v29 }
 0x457   :  { %v715_v30 = vpop.f32.mrf.mxu1 }
 0x458   :  { %v2399_v31 = vpop.eup %2398  ;;  %v716_v47 = vadd.f32 %v2836_v45, %v715_v30 }
 0x459   :  { %v539_v32 = vpack.c.bf16 %v2399_v31, %v2399_v31  ;;  %v2246_v33 = vpack.c.bf16 %v2399_v31, %v2397_v28 }
 0x45b   :  { %2338 = vst [vmem:[#allocation2 + $0x28] sm:$0xff] %v2246_v33   ;;  %v547_v35 = vunpack.c.l.b16 %v539_v32 }
 0x45d   :  { %v548_v36 = vpack.c.b16 %v547_v35, %v546_v34 }
 0x45f   :  { %558 = vmatmul.bf16.vlgmr.msrb.gmra.mxu2 %v548_v36  ;;  %v717_v37 = vpop.f32.mrf.mxu1 }
 0x460   :  { %958 = vmatpush.bf16.msrb.mxu2 %v2747_v59  ;;  %v718_v49 = vadd.f32 %v2836_v45, %v717_v37 }
 0x462   :  { %v2155_v38 = vld [vmem:[#allocation2 + $0x28] sm:$0xff] }
 0x463   :  { %744 = vmatmul.bf16.gmra.mxu3 %v2155_v38 }
 0x464   :  { %959 = vmatpush.bf16.msrb.mxu2 %v2751_v61 }
 0x467   :  { %v720_v39 = vpop.f32.mrf.mxu1 }
 0x468   :  { %960 = vmatpush.bf16.msrb.mxu2 %v2755_v6  ;;  %v721_v9 = vadd.f32 %v2836_v45, %v720_v39 }
 0x46c   :  { %961 = vmatpush.bf16.msrb.mxu2 %v2760_v8 }
 0x46f   :  { %v722_v40 = vpop.f32.mrf.mxu1 }
 0x470   :  { %962 = vmatpush.bf16.msrb.mxu2 %v2767_v10 }
 0x474   :  { %963 = vmatpush.bf16.msrb.mxu2 %v2770_v11 }
 0x477   :  { %v2823_v41 = vpop.f32.mrf.mxu1 }
 0x478   :  { %964 = vmatpush.bf16.msrb.mxu2 %v2777_v13  ;;  %v726_v24 = vadd.f32 %v2836_v45, %v2823_v41 }
 0x47c   :  { %965 = vmatpush.bf16.msrb.mxu2 %v2780_v14 }
 0x47f   :  { %v2827_v42 = vpop.f32.mrf.mxu1 }
 0x480   :  { %v728_v26 = vadd.f32 %v2836_v45, %v2827_v42 }
 0x487   :  { %v2829_v43 = vpop.f32.mrf.mxu1 }
 0x488   :  { %v731_v38 = vadd.f32 %v2836_v45, %v2829_v43  ;;  %v2187_v43 = vld [vmem:[#allocation4 + $0xb0] sm:$0xff] }
 0x48f   :  { %v2831_v44 = vpop.f32.mrf.mxu1 }
 0x497   :  { %v847_v46 = vpop.f32.mrf.mxu1 }
 0x498   :  { %v852_v48 = vadd.f32 %v847_v46, %v716_v47 }
 0x49a   :  { %2400 = vtanh.f32 %v852_v48 }
 0x49f   :  { %v849_v50 = vpop.f32.mrf.mxu1 }
 0x4a0   :  { %v853_v51 = vadd.f32 %v849_v50, %v718_v49  ;;  %v2401_v52 = vpop.eup %2400 }
 0x4a1   :  { %v856_v53 = vpack.c.bf16 %v2401_v52, %v2401_v52 }
 0x4a2   :  { %2402 = vtanh.f32 %v853_v51 }
 0x4a3   :  { %v864_v57 = vunpack.c.l.b16 %v856_v53 }
 0x4a8   :  { %v2403_v54 = vpop.eup %2402 }
 0x4a9   :  { %v857_v55 = vpack.c.bf16 %v2403_v54, %v2403_v54  ;;  %v2256_v56 = vpack.c.bf16 %v2403_v54, %v2401_v52  ;;  %v2188_v54 = vld [vmem:[#allocation4 + $0xb8] sm:$0xff] }
 0x4ab   :  { %2257 = vst [vmem:[#allocation2 + $0x30] sm:$0xff] %v2256_v56   ;;  %v865_v58 = vunpack.c.l.b16 %v857_v55  ;;  %v2186_v55 = vld [vmem:[#allocation4 + $0xa8] sm:$0xff]  ;;  %v2184_v56 = vld [vmem:[#allocation4 + $0x98] sm:$0xff] }
 0x4ad   :  { %v866_v60 = vpack.c.b16 %v865_v58, %v864_v57  ;;  %v2183_v57 = vld [vmem:[#allocation4 + $0x90] sm:$0xff]  ;;  %v735_v58 = vpop.f32.mrf.mxu3 }
 0x4af   :  { %876 = vmatmul.bf16.vlgmr.msra.gmra.mxu2 %v866_v60  ;;  %v2182_v60 = vld [vmem:[#allocation4 + $0x88] sm:$0xff] }
 0x4b0   :  { %1048 = vmatpush.bf16.msra.mxu2 %v2747_v59  ;;  %v256_v59 = vadd.f32 %v2710_v20, %v255_v1 }
 0x4b4   :  { %1049 = vmatpush.bf16.msra.mxu2 %v2751_v61 }
 0x4b8   :  { %1050 = vmatpush.bf16.msra.mxu2 %v2755_v6 }
 0x4bc   :  { %1051 = vmatpush.bf16.msra.mxu2 %v2760_v8 }
 0x4c0   :  { %1052 = vmatpush.bf16.msra.mxu2 %v2767_v10 }
 0x4c4   :  { %1053 = vmatpush.bf16.msra.mxu2 %v2770_v11  ;;  %v723_v11 = vadd.f32 %v2836_v45, %v722_v40  ;;  %v733_v40 = vadd.f32 %v2836_v45, %v2831_v44  ;;  %v2185_v44 = vld [vmem:[#allocation4 + $0xa0] sm:$0xff] }
 0x4c8   :  { %1054 = vmatpush.bf16.msra.mxu2 %v2777_v13 }
 0x4cc   :  { %1055 = vmatpush.bf16.msra.mxu2 %v2780_v14 }
 0x4e2   :  { %v559_v63 = vpop.f32.mrf.mxu2 }
 0x4e3   :  { %v564_v61 = vadd.f32 %v559_v63, %v254_v0  ;;  %v736_v63 = vadd.f32 %v2836_v45, %v735_v58  ;;  %v2181_v0 = vld [vmem:[#allocation4 + $0x80] sm:$0xff] }
 0x4e5   :  { %2404 = vtanh.f32 %v564_v61 }
 0x4ea   :  { %v561_v2 = vpop.f32.mrf.mxu2 }
 0x4eb   :  { %v565_v3 = vadd.f32 %v561_v2, %v256_v59  ;;  %v2405_v4 = vpop.eup %2404  ;;  %v737_v59 = vpop.f32.mrf.mxu3 }
 0x4ec   :  { %v738_v61 = vadd.f32 %v2836_v45, %v737_v59 }
 0x4ed   :  { %2406 = vtanh.f32 %v565_v3 }
 0x4f3   :  { %v2407_v5 = vpop.eup %2406 }
 0x4f4   :  { %v2251_v6 = vpack.c.bf16 %v2407_v5, %v2405_v4 }
 0x4f6   :  { %2339 = vst [vmem:[#allocation2 + $0x38] sm:$0xff] %v2251_v6  }
 0x4fd   :  { %v2156_v7 = vld [vmem:[#allocation2 + $0x38] sm:$0xff] }
 0x4fe   :  { %749 = vmatmul.bf16.gmra.mxu3 %v2156_v7 }
 0x532   :  { %v877_v8 = vpop.f32.mrf.mxu2 }
 0x533   :  { %v882_v10 = vadd.f32 %v877_v8, %v721_v9 }
 0x535   :  { %2408 = vtanh.f32 %v882_v10 }
 0x53a   :  { %v879_v12 = vpop.f32.mrf.mxu2 }
 0x53b   :  { %v883_v20 = vadd.f32 %v879_v12, %v723_v11  ;;  %v2409_v13 = vpop.eup %2408  ;;  %v2173_v12 = vld [vmem:[#allocation2 + $0x30] sm:$0xff] }
 0x53c   :  { %v886_v14 = vpack.c.bf16 %v2409_v13, %v2409_v13 }
 0x53d   :  { %2410 = vtanh.f32 %v883_v20 }
 0x53e   :  { %v894_v19 = vunpack.c.l.b16 %v886_v14 }
 0x543   :  { %v2411_v15 = vpop.eup %2410 }
 0x544   :  { %v2261_v16 = vpack.c.bf16 %v2411_v15, %v2409_v13  ;;  %v887_v18 = vpack.c.bf16 %v2411_v15, %v2411_v15 }
 0x546   :  { %2340 = vst [vmem:[#allocation2] sm:$0xff] %v2261_v16   ;;  %v895_v21 = vunpack.c.l.b16 %v887_v18  ;;  %v2862_v16 = vld [vmem:[#allocation6 + $0xb8] sm:$0xff]  ;;  %v2867_v18 = vld [vmem:[#allocation6 + $0xb0] sm:$0xff] }
 0x547   :  { %1396 = vmatpush.bf16.msrb.mxu3 %v2862_v16 }
 0x548   :  { %v896_v22 = vpack.c.b16 %v895_v21, %v894_v19  ;;  %v2872_v19 = vld [vmem:[#allocation6 + $0xa8] sm:$0xff]  ;;  %v2877_v21 = vld [vmem:[#allocation6 + $0xa0] sm:$0xff] }
 0x54a   :  { %906 = vmatmul.bf16.vlgmr.msrb.gmra.mxu0 %v896_v22  ;;  %v2882_v22 = vld [vmem:[#allocation6 + $0x98] sm:$0xff] }
 0x54b   :  { %1204 = vmatpush.bf16.msrb.mxu0 %v2188_v54  ;;  %1397 = vmatpush.bf16.msrb.mxu3 %v2867_v18 }
 0x54d   :  { %v2174_v20 = vld [vmem:[#allocation2] sm:$0xff] }
 0x54f   :  { %1205 = vmatpush.bf16.msrb.mxu0 %v2187_v43  ;;  %1398 = vmatpush.bf16.msrb.mxu3 %v2872_v19  ;;  %v2934_v43 = vld [vmem:[%s3043_s4 + $0x2] ss:$0 sm:$0xff] }
 0x553   :  { %1206 = vmatpush.bf16.msrb.mxu0 %v2186_v55  ;;  %1399 = vmatpush.bf16.msrb.mxu3 %v2877_v21 }
 0x557   :  { %1207 = vmatpush.bf16.msrb.mxu0 %v2185_v44  ;;  %1400 = vmatpush.bf16.msrb.mxu3 %v2882_v22 }
 0x55b   :  { %1208 = vmatpush.bf16.msrb.mxu0 %v2184_v56 }
 0x55f   :  { %1209 = vmatpush.bf16.msrb.mxu0 %v2183_v57 }
 0x563   :  { %1210 = vmatpush.bf16.msrb.mxu0 %v2182_v60 }
 0x567   :  { %1211 = vmatpush.bf16.msrb.mxu0 %v2181_v0 }
 0x5c7   :  { %v907_v23 = vpop.f32.mrf.mxu0 }
 0x5c8   :  { %v912_v25 = vadd.f32 %v907_v23, %v726_v24  ;;  %v2885_v23 = vld [vmem:[#allocation6 + $0x90] sm:$0xff]  ;;  %v740_v24 = vpop.f32.mrf.mxu3 }
 0x5c9   :  { %1401 = vmatpush.bf16.msrb.mxu3 %v2885_v23 }
 0x5ca   :  { %2412 = vtanh.f32 %v912_v25  ;;  %v2892_v25 = vld [vmem:[#allocation6 + $0x88] sm:$0xff] }
 0x5cd   :  { %1402 = vmatpush.bf16.msrb.mxu3 %v2892_v25 }
 0x5cf   :  { %v909_v27 = vpop.f32.mrf.mxu0 }
 0x5d0   :  { %v913_v28 = vadd.f32 %v909_v27, %v728_v26  ;;  %v2413_v29 = vpop.eup %2412  ;;  %v741_v27 = vadd.f32 %v2836_v45, %v740_v24 }
 0x5d1   :  { %v916_v30 = vpack.c.bf16 %v2413_v29, %v2413_v29 }
 0x5d2   :  { %2414 = vtanh.f32 %v913_v28  ;;  %v2896_v28 = vld [vmem:[#allocation6 + $0x80] sm:$0xff] }
 0x5d3   :  { %v924_v34 = vunpack.c.l.b16 %v916_v30  ;;  %v742_v30 = vpop.f32.mrf.mxu3  ;;  %1403 = vmatpush.bf16.msrb.mxu3 %v2896_v28 }
 0x5d7   :  { %1486 = vmatpush.bf16.msra.mxu3 %v2862_v16 }
 0x5d8   :  { %v2415_v31 = vpop.eup %2414 }
 0x5d9   :  { %v917_v32 = vpack.c.bf16 %v2415_v31, %v2415_v31  ;;  %v2266_v33 = vpack.c.bf16 %v2415_v31, %v2413_v29  ;;  %v743_v31 = vadd.f32 %v2836_v45, %v742_v30 }
 0x5db   :  { %2341 = vst [vmem:[#allocation2 + $0x18] sm:$0xff] %v2266_v33   ;;  %v925_v35 = vunpack.c.l.b16 %v917_v32  ;;  %1487 = vmatpush.bf16.msra.mxu3 %v2867_v18 }
 0x5dd   :  { %v926_v36 = vpack.c.b16 %v925_v35, %v924_v34 }
 0x5df   :  { %936 = vmatmul.bf16.vlgmr.msra.gmra.mxu1 %v926_v36  ;;  %1488 = vmatpush.bf16.msra.mxu3 %v2872_v19 }
 0x5e0   :  { %1336 = vmatpush.bf16.msra.mxu1 %v2862_v16 }
 0x5e2   :  { %v2175_v13 = vld [vmem:[#allocation2 + $0x18] sm:$0xff] }
 0x5e3   :  { %1489 = vmatpush.bf16.msra.mxu3 %v2877_v21 }
 0x5e4   :  { %1337 = vmatpush.bf16.msra.mxu1 %v2867_v18 }
 0x5e7   :  { %1490 = vmatpush.bf16.msra.mxu3 %v2882_v22 }
 0x5e8   :  { %1338 = vmatpush.bf16.msra.mxu1 %v2872_v19 }
 0x5eb   :  { %1491 = vmatpush.bf16.msra.mxu3 %v2885_v23 }
 0x5ec   :  { %1339 = vmatpush.bf16.msra.mxu1 %v2877_v21 }
 0x5ef   :  { %1492 = vmatpush.bf16.msra.mxu3 %v2892_v25 }
 0x5f0   :  { %1340 = vmatpush.bf16.msra.mxu1 %v2882_v22 }
 0x5f3   :  { %1493 = vmatpush.bf16.msra.mxu3 %v2896_v28 }
 0x5f4   :  { %1341 = vmatpush.bf16.msra.mxu1 %v2885_v23 }
 0x5f8   :  { %1342 = vmatpush.bf16.msra.mxu1 %v2892_v25 }
 0x5fc   :  { %1343 = vmatpush.bf16.msra.mxu1 %v2896_v28 }
 0x65c   :  { %v937_v37 = vpop.f32.mrf.mxu1 }
 0x65d   :  { %v942_v39 = vadd.f32 %v937_v37, %v731_v38 }
 0x65f   :  { %2416 = vtanh.f32 %v942_v39 }
 0x664   :  { %v939_v41 = vpop.f32.mrf.mxu1 }
 0x665   :  { %v943_v42 = vadd.f32 %v939_v41, %v733_v40  ;;  %v2417_v46 = vpop.eup %2416 }
 0x666   :  { %v946_v47 = vpack.c.bf16 %v2417_v46, %v2417_v46 }
 0x667   :  { %2418 = vtanh.f32 %v943_v42 }
 0x668   :  { %v954_v51 = vunpack.c.l.b16 %v946_v47 }
 0x66d   :  { %v2419_v48 = vpop.eup %2418 }
 0x66e   :  { %v947_v49 = vpack.c.bf16 %v2419_v48, %v2419_v48  ;;  %v2271_v50 = vpack.c.bf16 %v2419_v48, %v2417_v46 }
 0x670   :  { %2342 = vst [vmem:[#allocation2 + $0x10] sm:$0xff] %v2271_v50   ;;  %v955_v52 = vunpack.c.l.b16 %v947_v49 }
 0x672   :  { %v956_v53 = vpack.c.b16 %v955_v52, %v954_v51 }
 0x674   :  { %966 = vmatmul.bf16.vlgmr.msrb.gmra.mxu2 %v956_v53 }
 0x675   :  { %1366 = vmatpush.bf16.msrb.mxu2 %v2862_v16 }
 0x677   :  { %v2176_v14 = vld [vmem:[#allocation2 + $0x10] sm:$0xff] }
 0x679   :  { %1367 = vmatpush.bf16.msrb.mxu2 %v2867_v18 }
 0x67d   :  { %1368 = vmatpush.bf16.msrb.mxu2 %v2872_v19 }
 0x681   :  { %1369 = vmatpush.bf16.msrb.mxu2 %v2877_v21 }
 0x685   :  { %1370 = vmatpush.bf16.msrb.mxu2 %v2882_v22 }
 0x689   :  { %1371 = vmatpush.bf16.msrb.mxu2 %v2885_v23 }
 0x68d   :  { %1372 = vmatpush.bf16.msrb.mxu2 %v2892_v25 }
 0x691   :  { %1373 = vmatpush.bf16.msrb.mxu2 %v2896_v28 }
 0x6f7   :  { %v967_v62 = vpop.f32.mrf.mxu2 }
 0x6f8   :  { %v972_v1 = vadd.f32 %v967_v62, %v736_v63 }
 0x6fa   :  { %2420 = vtanh.f32 %v972_v1 }
 0x6ff   :  { %v969_v2 = vpop.f32.mrf.mxu2 }
 0x700   :  { %v973_v3 = vadd.f32 %v969_v2, %v738_v61  ;;  %v2421_v4 = vpop.eup %2420 }
 0x701   :  { %v976_v5 = vpack.c.bf16 %v2421_v4, %v2421_v4 }
 0x702   :  { %2422 = vtanh.f32 %v973_v3 }
 0x703   :  { %v984_v9 = vunpack.c.l.b16 %v976_v5 }
 0x708   :  { %v2423_v6 = vpop.eup %2422 }
 0x709   :  { %v977_v7 = vpack.c.bf16 %v2423_v6, %v2423_v6  ;;  %v2276_v8 = vpack.c.bf16 %v2423_v6, %v2421_v4 }
 0x70b   :  { %2343 = vst [vmem:[#allocation2 + $0x8] sm:$0xff] %v2276_v8   ;;  %v985_v10 = vunpack.c.l.b16 %v977_v7 }
 0x70d   :  { %v986_v11 = vpack.c.b16 %v985_v10, %v984_v9 }
 0x70f   :  { %996 = vmatmul.bf16.vlgmr.msra.gmra.mxu0 %v986_v11 }
 0x712   :  { %v2177_v15 = vld [vmem:[#allocation2 + $0x8] sm:$0xff] }
 0x71f   :  { %1212 = vmatmul.bf16.vlgmr.msrb.gmra.mxu0 %v2173_v12 }
 0x72f   :  { %1217 = vmatmul.bf16.gmra.mxu0 %v2174_v20 }
 0x73f   :  { %1222 = vmatmul.bf16.gmra.mxu0 %v2175_v13 }
 0x74f   :  { %1227 = vmatmul.bf16.gmra.mxu0 %v2176_v14 }
 0x75f   :  { %1232 = vmatmul.bf16.gmra.mxu0 %v2177_v15 }
 0x78c   :  { %v997_v26 = vpop.f32.mrf.mxu0 }
 0x78d   :  { %v1002_v29 = vadd.f32 %v997_v26, %v741_v27 }
 0x78f   :  { %2424 = vtanh.f32 %v1002_v29 }
 0x794   :  { %v999_v32 = vpop.f32.mrf.mxu0 }
 0x795   :  { %v1003_v33 = vadd.f32 %v999_v32, %v743_v31  ;;  %v2425_v34 = vpop.eup %2424 }
 0x796   :  { %v1006_v35 = vpack.c.bf16 %v2425_v34, %v2425_v34 }
 0x797   :  { %2426 = vtanh.f32 %v1003_v33 }
 0x798   :  { %v1014_v39 = vunpack.c.l.b16 %v1006_v35 }
 0x79c   :  { %v1213_v53 = vpop.f32.mrf.mxu0 }
 0x79d   :  { %v2427_v36 = vpop.eup %2426  ;;  %v1214_v57 = vadd.f32 %v2934_v43, %v1213_v53 }
 0x79e   :  { %v1007_v37 = vpack.c.bf16 %v2427_v36, %v2427_v36  ;;  %v2281_v38 = vpack.c.bf16 %v2427_v36, %v2425_v34 }
 0x7a0   :  { %2344 = vst [vmem:[#allocation2 + $0x20] sm:$0xff] %v2281_v38   ;;  %v1015_v40 = vunpack.c.l.b16 %v1007_v37 }
 0x7a2   :  { %v1016_v41 = vpack.c.b16 %v1015_v40, %v1014_v39 }
 0x7a4   :  { %1026 = vmatmul.bf16.vlgmr.msrb.gmra.mxu1 %v1016_v41  ;;  %v1215_v63 = vpop.f32.mrf.mxu0 }
 0x7a5   :  { %1426 = vmatpush.bf16.msrb.mxu1 %v2862_v16  ;;  %v1216_v61 = vadd.f32 %v2934_v43, %v1215_v63 }
 0x7a7   :  { %v2178_v42 = vld [vmem:[#allocation2 + $0x20] sm:$0xff] }
 0x7a8   :  { %1237 = vmatmul.bf16.gmra.mxu0 %v2178_v42 }
 0x7a9   :  { %1427 = vmatpush.bf16.msrb.mxu1 %v2867_v18 }
 0x7ac   :  { %v1218_v26 = vpop.f32.mrf.mxu0 }
 0x7ad   :  { %1428 = vmatpush.bf16.msrb.mxu1 %v2872_v19 }
 0x7b1   :  { %1429 = vmatpush.bf16.msrb.mxu1 %v2877_v21 }
 0x7b4   :  { %1344 = vmatmul.bf16.vlgmr.msra.gmra.mxu1 %v2549_v17  ;;  %v745_v17 = vpop.f32.mrf.mxu3  ;;  %v1220_v29 = vpop.f32.mrf.mxu0 }
 0x7b5   :  { %1430 = vmatpush.bf16.msrb.mxu1 %v2882_v22  ;;  %v746_v47 = vadd.f32 %v2836_v45, %v745_v17  ;;  %v1221_v30 = vadd.f32 %v2934_v43, %v1220_v29 }
 0x7b9   :  { %1431 = vmatpush.bf16.msrb.mxu1 %v2885_v23 }
 0x7bc   :  { %v747_v49 = vpop.f32.mrf.mxu3  ;;  %v1223_v41 = vpop.f32.mrf.mxu0 }
 0x7bd   :  { %1432 = vmatpush.bf16.msrb.mxu1 %v2892_v25  ;;  %v748_v50 = vadd.f32 %v2836_v45, %v747_v49  ;;  %v1224_v17 = vadd.f32 %v2934_v43, %v1223_v41 }
 0x7c1   :  { %1433 = vmatpush.bf16.msrb.mxu1 %v2896_v28 }
 0x7c4   :  { %v750_v20 = vpop.f32.mrf.mxu3 }
 0x7c5   :  { %1516 = vmatpush.bf16.msra.mxu1 %v2862_v16  ;;  %v751_v14 = vadd.f32 %v2836_v45, %v750_v20  ;;  %v2209_v20 = vld [vmem:[#allocation8 + $0x20] sm:$0xff] }
 0x7c9   :  { %1517 = vmatpush.bf16.msra.mxu1 %v2867_v18 }
 0x7cc   :  { %v752_v15 = vpop.f32.mrf.mxu3 }
 0x7cd   :  { %1518 = vmatpush.bf16.msra.mxu1 %v2872_v19 }
 0x7d1   :  { %1519 = vmatpush.bf16.msra.mxu1 %v2877_v21 }
 0x7d5   :  { %1520 = vmatpush.bf16.msra.mxu1 %v2882_v22 }
 0x7d9   :  { %1521 = vmatpush.bf16.msra.mxu1 %v2885_v23 }
 0x7dd   :  { %1522 = vmatpush.bf16.msra.mxu1 %v2892_v25 }
 0x7e1   :  { %1523 = vmatpush.bf16.msra.mxu1 %v2896_v28 }
 0x821   :  { %v1027_v46 = vpop.f32.mrf.mxu1 }
 0x822   :  { %v1032_v48 = vadd.f32 %v1027_v46, %v746_v47  ;;  %v1225_v47 = vpop.f32.mrf.mxu0 }
 0x824   :  { %2428 = vtanh.f32 %v1032_v48  ;;  %v1226_v48 = vadd.f32 %v2934_v43, %v1225_v47 }
 0x829   :  { %v1029_v51 = vpop.f32.mrf.mxu1 }
 0x82a   :  { %v1033_v52 = vadd.f32 %v1029_v51, %v748_v50  ;;  %v2429_v54 = vpop.eup %2428 }
 0x82b   :  { %v1036_v55 = vpack.c.bf16 %v2429_v54, %v2429_v54 }
 0x82c   :  { %2430 = vtanh.f32 %v1033_v52 }
 0x82d   :  { %v1044_v0 = vunpack.c.l.b16 %v1036_v55 }
 0x831   :  { %v1345_v44 = vpop.f32.mrf.mxu1 }
 0x832   :  { %v2431_v56 = vpop.eup %2430  ;;  %v1350_v62 = vadd.f32 %v1345_v44, %v1214_v57 }
 0x833   :  { %v1037_v58 = vpack.c.bf16 %v2431_v56, %v2431_v56  ;;  %v2286_v60 = vpack.c.bf16 %v2431_v56, %v2429_v54 }
 0x834   :  { %2432 = vtanh.f32 %v1350_v62 }
 0x835   :  { %2345 = vst [vmem:[#allocation2 + $0x28] sm:$0xff] %v2286_v60   ;;  %v1045_v1 = vunpack.c.l.b16 %v1037_v58  ;;  %v1228_v58 = vpop.f32.mrf.mxu0 }
 0x836   :  { %v1229_v62 = vadd.f32 %v2934_v43, %v1228_v58 }
 0x837   :  { %v1046_v59 = vpack.c.b16 %v1045_v1, %v1044_v0 }
 0x839   :  { %1056 = vmatmul.bf16.vlgmr.msra.gmra.mxu2 %v1046_v59  ;;  %v1347_v2 = vpop.f32.mrf.mxu1 }
 0x83a   :  { %v1351_v3 = vadd.f32 %v1347_v2, %v1216_v61  ;;  %1456 = vmatpush.bf16.msra.mxu2 %v2862_v16  ;;  %v2433_v5 = vpop.eup %2432 }
 0x83b   :  { %v1354_v6 = vpack.c.bf16 %v2433_v5, %v2433_v5 }
 0x83c   :  { %2434 = vtanh.f32 %v1351_v3  ;;  %v2179_v4 = vld [vmem:[#allocation2 + $0x28] sm:$0xff] }
 0x83d   :  { %1242 = vmatmul.bf16.gmra.mxu0 %v2179_v4  ;;  %v1362_v10 = vunpack.c.l.b16 %v1354_v6  ;;  %v1230_v0 = vpop.f32.mrf.mxu0 }
 0x83e   :  { %1457 = vmatpush.bf16.msra.mxu2 %v2867_v18  ;;  %v1231_v1 = vadd.f32 %v2934_v43, %v1230_v0 }
 0x842   :  { %v2435_v7 = vpop.eup %2434  ;;  %1458 = vmatpush.bf16.msra.mxu2 %v2872_v19 }
 0x843   :  { %v1355_v8 = vpack.c.bf16 %v2435_v7, %v2435_v7  ;;  %v2296_v9 = vpack.c.bf16 %v2435_v7, %v2433_v5 }
 0x845   :  { %2297 = vst [vmem:[#allocation2 + $0x30] sm:$0xff] %v2296_v9   ;;  %v1363_v11 = vunpack.c.l.b16 %v1355_v8 }
 0x846   :  { %1459 = vmatpush.bf16.msra.mxu2 %v2877_v21 }
 0x847   :  { %v1364_v12 = vpack.c.b16 %v1363_v11, %v1362_v10  ;;  %v2212_v10 = vld [vmem:[#allocation8 + $0x38] sm:$0xff]  ;;  %v2211_v11 = vld [vmem:[#allocation8 + $0x30] sm:$0xff] }
 0x849   :  { %1374 = vmatmul.bf16.vlgmr.msrb.gmra.mxu2 %v1364_v12  ;;  %v2210_v12 = vld [vmem:[#allocation8 + $0x28] sm:$0xff] }
 0x84a   :  { %1460 = vmatpush.bf16.msra.mxu2 %v2882_v22 }
 0x84e   :  { %1461 = vmatpush.bf16.msra.mxu2 %v2885_v23 }
 0x852   :  { %1462 = vmatpush.bf16.msra.mxu2 %v2892_v25 }
 0x856   :  { %1463 = vmatpush.bf16.msra.mxu2 %v2896_v28 }
 0x85a   :  { %1546 = vmatpush.bf16.msrb.mxu2 %v2862_v16 }
 0x85e   :  { %1547 = vmatpush.bf16.msrb.mxu2 %v2867_v18  ;;  %v753_v18 = vadd.f32 %v2836_v45, %v752_v15  ;;  %v1233_v15 = vpop.f32.mrf.mxu0 }
 0x862   :  { %1548 = vmatpush.bf16.msrb.mxu2 %v2872_v19 }
 0x866   :  { %1549 = vmatpush.bf16.msrb.mxu2 %v2877_v21 }
 0x86a   :  { %1550 = vmatpush.bf16.msrb.mxu2 %v2882_v22 }
 0x86e   :  { %1551 = vmatpush.bf16.msrb.mxu2 %v2885_v23 }
 0x872   :  { %1552 = vmatpush.bf16.msrb.mxu2 %v2892_v25  ;;  %v1219_v25 = vadd.f32 %v2934_v43, %v1218_v26 }
 0x876   :  { %1553 = vmatpush.bf16.msrb.mxu2 %v2896_v28 }
 0x8bc   :  { %v1057_v13 = vpop.f32.mrf.mxu2 }
 0x8bd   :  { %v1062_v16 = vadd.f32 %v1057_v13, %v751_v14  ;;  %v2208_v13 = vld [vmem:[#allocation8 + $0x18] sm:$0xff]  ;;  %v2207_v14 = vld [vmem:[#allocation8 + $0x10] sm:$0xff] }
 0x8bf   :  { %2436 = vtanh.f32 %v1062_v16  ;;  %v2206_v16 = vld [vmem:[#allocation8 + $0x8] sm:$0xff] }
 0x8c4   :  { %v1059_v24 = vpop.f32.mrf.mxu2 }
 0x8c5   :  { %v1063_v19 = vadd.f32 %v1059_v24, %v753_v18  ;;  %v2437_v21 = vpop.eup %2436  ;;  %v1234_v24 = vadd.f32 %v2934_v43, %v1233_v15 }
 0x8c7   :  { %2438 = vtanh.f32 %v1063_v19  ;;  %v2205_v19 = vld [vmem:[#allocation8] sm:$0xff] }
 0x8cc   :  { %v1375_v22 = vpop.f32.mrf.mxu2 }
 0x8cd   :  { %v2439_v23 = vpop.eup %2438  ;;  %v1380_v28 = vadd.f32 %v1375_v22, %v1219_v25 }
 0x8ce   :  { %v2291_v27 = vpack.c.bf16 %v2439_v23, %v2437_v21  ;;  %v1235_v21 = vpop.f32.mrf.mxu0 }
 0x8cf   :  { %2440 = vtanh.f32 %v1380_v28  ;;  %v1236_v22 = vadd.f32 %v2934_v43, %v1235_v21 }
 0x8d0   :  { %2346 = vst [vmem:[#allocation2 + $0x38] sm:$0xff] %v2291_v27  }
 0x8d4   :  { %v1377_v31 = vpop.f32.mrf.mxu2 }
 0x8d5   :  { %v1381_v32 = vadd.f32 %v1377_v31, %v1221_v30  ;;  %v2441_v33 = vpop.eup %2440 }
 0x8d6   :  { %v1384_v34 = vpack.c.bf16 %v2441_v33, %v2441_v33 }
 0x8d7   :  { %2442 = vtanh.f32 %v1381_v32  ;;  %v2180_v45 = vld [vmem:[#allocation2 + $0x38] sm:$0xff] }
 0x8d8   :  { %1247 = vmatmul.bf16.gmra.mxu0 %v2180_v45  ;;  %v1392_v38 = vunpack.c.l.b16 %v1384_v34  ;;  %v2197_v34 = vld [vmem:[#allocation2 + $0x30] sm:$0xff] }
 0x8dd   :  { %v2443_v35 = vpop.eup %2442 }
 0x8de   :  { %v1385_v36 = vpack.c.bf16 %v2443_v35, %v2443_v35  ;;  %v2301_v37 = vpack.c.bf16 %v2443_v35, %v2441_v33 }
 0x8e0   :  { %2347 = vst [vmem:[#allocation2] sm:$0xff] %v2301_v37   ;;  %v1393_v39 = vunpack.c.l.b16 %v1385_v36 }
 0x8e2   :  { %v1394_v40 = vpack.c.b16 %v1393_v39, %v1392_v38  ;;  %v1238_v39 = vpop.f32.mrf.mxu0 }
 0x8e3   :  { %v1239_v41 = vadd.f32 %v2934_v43, %v1238_v39 }
 0x8e4   :  { %1404 = vmatmul.bf16.vlgmr.msrb.gmra.mxu3 %v1394_v40 }
 0x8e5   :  { %1700 = vmatpush.bf16.msrb.mxu3 %v2212_v10 }
 0x8e7   :  { %v2198_v35 = vld [vmem:[#allocation2] sm:$0xff] }
 0x8e9   :  { %1701 = vmatpush.bf16.msrb.mxu3 %v2211_v11 }
 0x8ed   :  { %1702 = vmatpush.bf16.msrb.mxu3 %v2210_v12 }
 0x8f1   :  { %1703 = vmatpush.bf16.msrb.mxu3 %v2209_v20 }
 0x8f5   :  { %1704 = vmatpush.bf16.msrb.mxu3 %v2208_v13 }
 0x8f9   :  { %1705 = vmatpush.bf16.msrb.mxu3 %v2207_v14 }
 0x8fd   :  { %1706 = vmatpush.bf16.msrb.mxu3 %v2206_v16 }
 0x901   :  { %1707 = vmatpush.bf16.msrb.mxu3 %v2205_v19 }
 0x967   :  { %v1405_v42 = vpop.f32.mrf.mxu3 }
 0x968   :  { %v1410_v46 = vadd.f32 %v1405_v42, %v1224_v17  ;;  %v1240_v17 = vpop.f32.mrf.mxu0 }
 0x96a   :  { %2444 = vtanh.f32 %v1410_v46  ;;  %v1241_v46 = vadd.f32 %v2934_v43, %v1240_v17 }
 0x96f   :  { %v1407_v49 = vpop.f32.mrf.mxu3 }
 0x970   :  { %v1411_v50 = vadd.f32 %v1407_v49, %v1226_v48  ;;  %v2445_v51 = vpop.eup %2444  ;;  %v1243_v13 = vpop.f32.mrf.mxu0 }
 0x971   :  { %v1414_v52 = vpack.c.bf16 %v2445_v51, %v2445_v51  ;;  %v1244_v15 = vadd.f32 %v2934_v43, %v1243_v13 }
 0x972   :  { %2446 = vtanh.f32 %v1411_v50  ;;  %v2969_v50 = vld [vmem:[%s3046_s7] ss:$0 sm:$0xff] }
 0x973   :  { %v1422_v44 = vunpack.c.l.b16 %v1414_v52 }
 0x978   :  { %v2447_v53 = vpop.eup %2446 }
 0x979   :  { %v1415_v54 = vpack.c.bf16 %v2447_v53, %v2447_v53  ;;  %v2306_v55 = vpack.c.bf16 %v2447_v53, %v2445_v51 }
 0x97b   :  { %2348 = vst [vmem:[#allocation2 + $0x18] sm:$0xff] %v2306_v55   ;;  %v1423_v56 = vunpack.c.l.b16 %v1415_v54 }
 0x97d   :  { %v1424_v57 = vpack.c.b16 %v1423_v56, %v1422_v44 }
 0x97f   :  { %1434 = vmatmul.bf16.vlgmr.msrb.gmra.mxu1 %v1424_v57 }
 0x982   :  { %v2199_v36 = vld [vmem:[#allocation2 + $0x18] sm:$0xff] }
 0x9fc   :  { %v1435_v60 = vpop.f32.mrf.mxu1 }
 0x9fd   :  { %v1440_v63 = vadd.f32 %v1435_v60, %v1229_v62 }
 0x9ff   :  { %2448 = vtanh.f32 %v1440_v63 }
 0xa04   :  { %v1437_v59 = vpop.f32.mrf.mxu1 }
 0xa05   :  { %v1441_v61 = vadd.f32 %v1437_v59, %v1231_v1  ;;  %v2449_v2 = vpop.eup %2448 }
 0xa06   :  { %v1444_v3 = vpack.c.bf16 %v2449_v2, %v2449_v2 }
 0xa07   :  { %2450 = vtanh.f32 %v1441_v61 }
 0xa08   :  { %v1452_v7 = vunpack.c.l.b16 %v1444_v3 }
 0xa0d   :  { %v2451_v4 = vpop.eup %2450 }
 0xa0e   :  { %v1445_v5 = vpack.c.bf16 %v2451_v4, %v2451_v4  ;;  %v2311_v6 = vpack.c.bf16 %v2451_v4, %v2449_v2 }
 0xa10   :  { %2349 = vst [vmem:[#allocation2 + $0x10] sm:$0xff] %v2311_v6   ;;  %v1453_v8 = vunpack.c.l.b16 %v1445_v5 }
 0xa12   :  { %v1454_v9 = vpack.c.b16 %v1453_v8, %v1452_v7 }
 0xa14   :  { %1464 = vmatmul.bf16.vlgmr.msra.gmra.mxu2 %v1454_v9 }
 0xa17   :  { %v2200_v37 = vld [vmem:[#allocation2 + $0x10] sm:$0xff] }
 0xa97   :  { %v1465_v18 = vpop.f32.mrf.mxu2 }
 0xa98   :  { %v1470_v26 = vadd.f32 %v1465_v18, %v1234_v24  ;;  %v1245_v18 = vpop.f32.mrf.mxu0 }
 0xa99   :  { %v1246_v24 = vadd.f32 %v2934_v43, %v1245_v18 }
 0xa9a   :  { %2452 = vtanh.f32 %v1470_v26 }
 0xa9f   :  { %v1467_v23 = vpop.f32.mrf.mxu2 }
 0xaa0   :  { %v1471_v25 = vadd.f32 %v1467_v23, %v1236_v22  ;;  %v2453_v27 = vpop.eup %2452 }
 0xaa1   :  { %v1474_v28 = vpack.c.bf16 %v2453_v27, %v2453_v27 }
 0xaa2   :  { %2454 = vtanh.f32 %v1471_v25 }
 0xaa3   :  { %v1482_v32 = vunpack.c.l.b16 %v1474_v28 }
 0xaa8   :  { %v2455_v29 = vpop.eup %2454 }
 0xaa9   :  { %v1475_v30 = vpack.c.bf16 %v2455_v29, %v2455_v29  ;;  %v2316_v31 = vpack.c.bf16 %v2455_v29, %v2453_v27 }
 0xaab   :  { %2350 = vst [vmem:[#allocation2 + $0x8] sm:$0xff] %v2316_v31   ;;  %v1483_v45 = vunpack.c.l.b16 %v1475_v30 }
 0xaad   :  { %v1484_v33 = vpack.c.b16 %v1483_v45, %v1482_v32 }
 0xaaf   :  { %1494 = vmatmul.bf16.vlgmr.msra.gmra.mxu3 %v1484_v33 }
 0xab2   :  { %v2201_v38 = vld [vmem:[#allocation2 + $0x8] sm:$0xff] }
 0xabf   :  { %1708 = vmatmul.bf16.vlgmr.msrb.gmra.mxu3 %v2197_v34 }
 0xacf   :  { %1713 = vmatmul.bf16.gmra.mxu3 %v2198_v35  ;;  %v1248_v35 = vpop.f32.mrf.mxu0 }
 0xadf   :  { %1718 = vmatmul.bf16.gmra.mxu3 %v2199_v36 }
 0xaef   :  { %1723 = vmatmul.bf16.gmra.mxu3 %v2200_v37  ;;  %v1249_v37 = vadd.f32 %v2934_v43, %v1248_v35 }
 0xaff   :  { %1728 = vmatmul.bf16.gmra.mxu3 %v2201_v38  ;;  %v1250_v38 = vpop.f32.mrf.mxu0 }
 0xb32   :  { %v1495_v40 = vpop.f32.mrf.mxu3 }
 0xb33   :  { %v1500_v42 = vadd.f32 %v1495_v40, %v1239_v41 }
 0xb35   :  { %2456 = vtanh.f32 %v1500_v42  ;;  %v1251_v42 = vadd.f32 %v2934_v43, %v1250_v38 }
 0xb3a   :  { %v1497_v47 = vpop.f32.mrf.mxu3 }
 0xb3b   :  { %v1501_v48 = vadd.f32 %v1497_v47, %v1241_v46  ;;  %v2457_v49 = vpop.eup %2456 }
 0xb3c   :  { %v1504_v51 = vpack.c.bf16 %v2457_v49, %v2457_v49 }
 0xb3d   :  { %2458 = vtanh.f32 %v1501_v48 }
 0xb3e   :  { %v1512_v56 = vunpack.c.l.b16 %v1504_v51 }
 0xb42   :  { %v1709_v52 = vpop.f32.mrf.mxu3 }
 0xb43   :  { %v2459_v53 = vpop.eup %2458  ;;  %v1710_v54 = vadd.f32 %v2969_v50, %v1709_v52 }
 0xb44   :  { %v1505_v55 = vpack.c.bf16 %v2459_v53, %v2459_v53  ;;  %v2321_v44 = vpack.c.bf16 %v2459_v53, %v2457_v49 }
 0xb45   :  { %1749 = vst [vmem:[%s3047_s8] sm:$0xff] %v1710_v54 }
 0xb46   :  { %2351 = vst [vmem:[#allocation2 + $0x20] sm:$0xff] %v2321_v44   ;;  %v1513_v57 = vunpack.c.l.b16 %v1505_v55 }
 0xb48   :  { %v1514_v58 = vpack.c.b16 %v1513_v57, %v1512_v56 }
 0xb4a   :  { %1524 = vmatmul.bf16.vlgmr.msra.gmra.mxu1 %v1514_v58  ;;  %v1711_v60 = vpop.f32.mrf.mxu3 }
 0xb4b   :  { %v1712_v62 = vadd.f32 %v2969_v50, %v1711_v60 }
 0xb4d   :  { %1750 = vst [vmem:[%s3047_s8 + $0x8] sm:$0xff] %v1712_v62  ;;  %v2202_v63 = vld [vmem:[#allocation2 + $0x20] sm:$0xff] }
 0xb4e   :  { %1733 = vmatmul.bf16.gmra.mxu3 %v2202_v63 }
 0xb52   :  { %v1714_v0 = vpop.f32.mrf.mxu3 }
 0xb53   :  { %v1715_v1 = vadd.f32 %v2969_v50, %v1714_v0 }
 0xb55   :  { %1751 = vst [vmem:[%s3047_s8 + $0x10] sm:$0xff] %v1715_v1 }
 0xb5a   :  { %v1716_v59 = vpop.f32.mrf.mxu3 }
 0xb5b   :  { %v1717_v61 = vadd.f32 %v2969_v50, %v1716_v59 }
 0xb5d   :  { %1752 = vst [vmem:[%s3047_s8 + $0x18] sm:$0xff] %v1717_v61 }
 0xb62   :  { %v1719_v2 = vpop.f32.mrf.mxu3 }
 0xb63   :  { %v1720_v3 = vadd.f32 %v2969_v50, %v1719_v2 }
 0xb65   :  { %1753 = vst [vmem:[%s3047_s8 + $0x20] sm:$0xff] %v1720_v3 }
 0xb6a   :  { %v1721_v4 = vpop.f32.mrf.mxu3 }
 0xb6b   :  { %v1722_v5 = vadd.f32 %v2969_v50, %v1721_v4 }
 0xb6d   :  { %1754 = vst [vmem:[%s3047_s8 + $0x28] sm:$0xff] %v1722_v5 }
 0xb72   :  { %v1724_v6 = vpop.f32.mrf.mxu3 }
 0xb73   :  { %v1725_v7 = vadd.f32 %v2969_v50, %v1724_v6 }
 0xb75   :  { %1755 = vst [vmem:[%s3047_s8 + $0x30] sm:$0xff] %v1725_v7 }
 0xb7a   :  { %v1726_v8 = vpop.f32.mrf.mxu3 }
 0xb7b   :  { %v1727_v9 = vadd.f32 %v2969_v50, %v1726_v8 }
 0xb7d   :  { %1756 = vst [vmem:[%s3047_s8 + $0x38] sm:$0xff] %v1727_v9 }
 0xb82   :  { %v1729_v10 = vpop.f32.mrf.mxu3 }
 0xb83   :  { %v1730_v11 = vadd.f32 %v2969_v50, %v1729_v10 }
 0xb85   :  { %1757 = vst [vmem:[%s3047_s8 + $0x40] sm:$0xff] %v1730_v11 }
 0xb8a   :  { %v1731_v12 = vpop.f32.mrf.mxu3 }
 0xb8b   :  { %v1732_v20 = vadd.f32 %v2969_v50, %v1731_v12 }
 0xb8d   :  { %1758 = vst [vmem:[%s3047_s8 + $0x48] sm:$0xff] %v1732_v20 }
 0xbc7   :  { %v1525_v14 = vpop.f32.mrf.mxu1 }
 0xbc8   :  { %v1530_v16 = vadd.f32 %v1525_v14, %v1244_v15 }
 0xbca   :  { %2460 = vtanh.f32 %v1530_v16 }
 0xbcf   :  { %v1527_v19 = vpop.f32.mrf.mxu1 }
 0xbd0   :  { %v1531_v26 = vadd.f32 %v1527_v19, %v1246_v24  ;;  %v2461_v23 = vpop.eup %2460 }
 0xbd1   :  { %v1734_v21 = vpop.f32.mrf.mxu3  ;;  %v1534_v25 = vpack.c.bf16 %v2461_v23, %v2461_v23 }
 0xbd2   :  { %2462 = vtanh.f32 %v1531_v26  ;;  %v1735_v22 = vadd.f32 %v2969_v50, %v1734_v21 }
 0xbd3   :  { %v1542_v31 = vunpack.c.l.b16 %v1534_v25 }
 0xbd4   :  { %1759 = vst [vmem:[%s3047_s8 + $0x50] sm:$0xff] %v1735_v22 }
 0xbd8   :  { %v2463_v27 = vpop.eup %2462 }
 0xbd9   :  { %v1535_v28 = vpack.c.bf16 %v2463_v27, %v2463_v27  ;;  %v2326_v29 = vpack.c.bf16 %v2463_v27, %v2461_v23  ;;  %v1736_v30 = vpop.f32.mrf.mxu3 }
 0xbda   :  { %v1737_v45 = vadd.f32 %v2969_v50, %v1736_v30 }
 0xbdb   :  { %2352 = vst [vmem:[#allocation2 + $0x28] sm:$0xff] %v2326_v29   ;;  %v1543_v32 = vunpack.c.l.b16 %v1535_v28 }
 0xbdc   :  { %1760 = vst [vmem:[%s3047_s8 + $0x58] sm:$0xff] %v1737_v45 }
 0xbdd   :  { %v1544_v33 = vpack.c.b16 %v1543_v32, %v1542_v31 }
 0xbdf   :  { %1554 = vmatmul.bf16.vlgmr.msrb.gmra.mxu2 %v1544_v33 }
 0xbe2   :  { %v2203_v34 = vld [vmem:[#allocation2 + $0x28] sm:$0xff] }
 0xbe3   :  { %1738 = vmatmul.bf16.gmra.mxu3 %v2203_v34 }
 0xc62   :  { %v1555_v36 = vpop.f32.mrf.mxu2 }
 0xc63   :  { %v1560_v40 = vadd.f32 %v1555_v36, %v1249_v37 }
 0xc65   :  { %2464 = vtanh.f32 %v1560_v40 }
 0xc66   :  { %v1739_v39 = vpop.f32.mrf.mxu3 }
 0xc67   :  { %v1740_v41 = vadd.f32 %v2969_v50, %v1739_v39 }
 0xc69   :  { %1761 = vst [vmem:[%s3047_s8 + $0x60] sm:$0xff] %v1740_v41 }
 0xc6a   :  { %v1557_v17 = vpop.f32.mrf.mxu2 }
 0xc6b   :  { %v1561_v46 = vadd.f32 %v1557_v17, %v1251_v42  ;;  %v2465_v49 = vpop.eup %2464 }
 0xc6d   :  { %2466 = vtanh.f32 %v1561_v46 }
 0xc6e   :  { %v1741_v47 = vpop.f32.mrf.mxu3 }
 0xc6f   :  { %v1742_v48 = vadd.f32 %v2969_v50, %v1741_v47 }
 0xc71   :  { %1762 = vst [vmem:[%s3047_s8 + $0x68] sm:$0xff] %v1742_v48 }
 0xc73   :  { %v2467_v51 = vpop.eup %2466 }
 0xc74   :  { %v2331_v52 = vpack.c.bf16 %v2467_v51, %v2465_v49 }
 0xc76   :  { %2353 = vst [vmem:[#allocation2 + $0x38] sm:$0xff] %v2331_v52  }
 0xc7d   :  { %v2204_v43 = vld [vmem:[#allocation2 + $0x38] sm:$0xff] }
 0xc7e   :  { %1743 = vmatmul.bf16.gmra.mxu3 %v2204_v43 }
 0xd01   :  { %v1744_v53 = vpop.f32.mrf.mxu3 }
 0xd02   :  { %v1745_v54 = vadd.f32 %v2969_v50, %v1744_v53 }
 0xd04   :  { %1763 = vst [vmem:[%s3047_s8 + $0x70] sm:$0xff] %v1745_v54 }
 0xd09   :  { %v1746_v55 = vpop.f32.mrf.mxu3 }
 0xd0a   :  { %v1747_v44 = vadd.f32 %v2969_v50, %v1746_v55 }
 0xd0c   :  { %1764 = vst [vmem:[%s3047_s8 + $0x78] sm:$0xff] %v1747_v44 }
 0xd0d   :  { %1769 = vsyncpa [#allocation5], 1 }
 0xd0e   :  { %1770 = vsyncpa [#allocation7], 1 }

</bundles_post_ra>
